<compile_context>
chip_gen: v6e
topology: v6e:2x2x1
jax: 0.10.0
libtpu: 0.0.40
codegen_flags: <defaults>
</compile_context>

<pallas_src>
import functools

import jax
import jax.numpy as jnp
import numpy as np
from jax.experimental import pallas as pl
from jax.experimental.pallas import tpu as pltpu

EPS = 1e-6

_PARAM_ORDER = ("n1w", "n1b", "w1", "b1", "w2", "b2", "scaw", "scab",
                "w3", "b3", "beta", "n2w", "n2b", "w4", "b4", "w5", "b5", "gamma")


def _layer_norm(x, w, b):
    """LayerNorm2d: per-pixel normalization over channels (biased variance).

    Channel reductions go through jnp.sum along the sublane axis (XLU cross-
    sublane reduce) so the saturated VALU slot stays free.
    """
    c = x.shape[0]
    mu = jnp.sum(x, axis=0, keepdims=True) * (1.0 / c)
    xc = x - mu
    var = jnp.sum(xc * xc, axis=0, keepdims=True) * (1.0 / c)
    return xc * jax.lax.rsqrt(var + EPS) * w + b


def _pointwise_conv(w, b, x):
    """1x1 conv: (Cout, Cin) @ (Cin, P) + (Cout, 1).

    For tiny Cin the MXU would run at <1% utilization and pay push/pop latency,
    so unroll as VPU broadcast-MACs; fall back to a matmul for large Cin.
    """
    cout, cin = w.shape
    if cin <= 16:
        out = w[:, 0:1] * x[0:1, :]
        for k in range(1, cin):
            out = out + w[:, k:k + 1] * x[k:k + 1, :]
        return out + b
    # TODO(synk): at production Cin (>=32) pad the contraction dim toward 128
    # and cast operands to bf16 (f32 accumulation) to use the MXU efficiently.
    return jnp.dot(w, x, preferred_element_type=jnp.float32) + b


def _mod_lanes(p, m):
    """p % m for an int32 lane-iota, avoiding vector integer div/rem."""
    if (m & (m - 1)) == 0:                      # power of two -> single AND
        return jnp.bitwise_and(p, m - 1)
    # General case via f32; exact for p < 2**23 (far above any VMEM-feasible
    # block size).
    pf = p.astype(jnp.float32)
    return (pf - m * jnp.floor(pf / m)).astype(jnp.int32)


def nafblock_kernel(
    H, W, B, layout,      # static, bound via functools.partial
    x_ref,                # (C, P)     P = B*H*W (lane-dense)
    slab_ref,             # (R, Cmax)  all parameters packed, sublane-aligned
    out_ref,              # (C, P)
):
    C, P = x_ref.shape
    HW = H * W

    def getp(name):
        off, r, c = layout[name]
        return slab_ref[off:off + r, 0:c]

    n1w, n1b = getp("n1w"), getp("n1b")
    w1, b1 = getp("w1"), getp("b1")
    w2, b2 = getp("w2"), getp("b2")
    scaw, scab = getp("scaw"), getp("scab")
    w3, b3 = getp("w3"), getp("b3")
    beta = getp("beta")
    n2w, n2b = getp("n2w"), getp("n2b")
    w4, b4 = getp("w4"), getp("b4")
    w5, b5 = getp("w5"), getp("b5")
    gamma = getp("gamma")

    DW = w1.shape[0]
    DWH = DW // 2
    FFNH = w4.shape[0] // 2

    x_in = x_ref[...].astype(jnp.float32)                      # (C, P)

    # --- depthwise-conv boundary masks, generated in-kernel (no HBM DMA) ----
    # i = (p // W) % H and j = p % W are only needed through the comparisons
    #   j   >= 1, j   <= W-2   <->  (p % W)  >= 1,  (p % W)  <  W-1
    #   i   >= 1, i   <= H-2   <->  (p % HW) >= W,  (p % HW) <  HW-W
    # so image boundaries inside a multi-image block are respected.
    p_idx = jax.lax.broadcasted_iota(jnp.int32, (1, P), 1)
    col = _mod_lanes(p_idx, W)
    rowo = _mod_lanes(p_idx, HW)
    ok_l = jnp.where(col >= 1, 1.0, 0.0)          # j-1 in image
    ok_r = jnp.where(col < W - 1, 1.0, 0.0)       # j+1 in image
    ok_u = jnp.where(rowo >= W, 1.0, 0.0)         # i-1 in image
    ok_d = jnp.where(rowo < HW - W, 1.0, 0.0)     # i+1 in image
    row_mask = {-1: ok_u, 0: None, 1: ok_d}
    col_mask = {-1: ok_l, 0: None, 1: ok_r}

    # ---------------- branch 1 ----------------
    x = _layer_norm(x_in, n1w, n1b)
    x = _pointwise_conv(w1, b1, x)                              # (DW, P)

    # Depthwise 3x3 conv (padding=1, stride=1): 8 XLU lane-rotations
    # (pltpu.roll) + mask-gated broadcast-MACs accumulated in registers.
    acc = None
    for dy in (-1, 0, 1):
        for dx in (-1, 0, 1):
            t = (dy + 1) * 3 + (dx + 1)
            s = dy * W + dx                                     # source offset
            if s == 0:
                contrib = x
            else:
                # contrib[:, p] = x[:, p + s]; wrapped lanes are masked out.
                shifted = pltpu.roll(x, shift=(-s) % P, axis=1)
                m = row_mask[dy]
                cm = col_mask[dx]
                if m is None:
                    m = cm
                elif cm is not None:
                    m = m * cm
                contrib = m * shifted
            term = w2[:, t:t + 1] * contrib
            acc = term if acc is None else acc + term
    x = acc + b2                                                # (DW, P)

    # SimpleGate: split channels in half, multiply.
    x = x[:DWH, :] * x[DWH:, :]                                 # (DWH, P)

    # SCA: per-image global average pool (lane reduce) -> one batched 1x1 conv
    # over all B pooled columns -> per-image lane-splat scaling.
    pooled = [jnp.mean(x[:, b_i * HW:(b_i + 1) * HW], axis=1, keepdims=True)
              for b_i in range(B)]
    pooled = pooled[0] if B == 1 else jnp.concatenate(pooled, axis=1)  # (DWH,B)
    scales = _pointwise_conv(scaw, scab, pooled)                       # (DWH,B)
    pieces = [x[:, b_i * HW:(b_i + 1) * HW] * scales[:, b_i:b_i + 1]
              for b_i in range(B)]
    x = pieces[0] if B == 1 else jnp.concatenate(pieces, axis=1)

    x = _pointwise_conv(w3, b3, x)                              # (C, P)
    y = x_in + x * beta

    # ---------------- branch 2 (FFN) ----------------
    x = _layer_norm(y, n2w, n2b)
    x = _pointwise_conv(w4, b4, x)                              # (FFN, P)
    x = x[:FFNH, :] * x[FFNH:, :]                               # SimpleGate
    x = _pointwise_conv(w5, b5, x)                              # (C, P)
    out = y + x * gamma

    out_ref[...] = out.astype(out_ref.dtype)


def _pack_param_slab(params):
    """Pack all parameters into one (rows, max_cols) f32 slab.

    Each parameter starts at a sublane-aligned (multiple of 8) row offset so
    the in-kernel static slices never straddle tile boundaries.  One slab means
    one prologue DMA instead of ~17 tiny padded ones.
    """
    max_cols = max(int(params[n].shape[1]) for n in _PARAM_ORDER)
    layout = {}
    rows = 0
    for n in _PARAM_ORDER:
        r, c = (int(d) for d in params[n].shape)
        layout[n] = (rows, r, c)
        rows += ((r + 7) // 8) * 8
    slab = np.zeros((rows, max_cols), np.float32)
    for n in _PARAM_ORDER:
        off, r, c = layout[n]
        slab[off:off + r, :c] = np.asarray(params[n], np.float32)
    return jnp.asarray(slab), layout


def nafblock(inp, params, block_images=8):
    """inp: (N, C, H, W) float32 (module-native NCHW). params: see init_params."""
    N, C, H, W = inp.shape
    HW = H * W

    # Block/grid selection: per-block lane count must be a multiple of 128
    # (unless one block covers the whole array), and we keep >= 2 grid steps
    # so v7x's two TensorCores both get work and IO DMAs pipeline vs compute.
    max_imgs = min(block_images, N if N == 1 else N // 2)
    B = None
    for cand in range(max(1, max_imgs), 0, -1):
        if N % cand == 0 and (cand * HW) % 128 == 0:
            B = cand
            break
    if B is None:
        B = N                       # single whole-array block is always legal
    P = B * HW
    grid = N // B

    # Layout plumbing in the wrapper (free for XLA): NCHW -> (C, N*H*W) puts
    # channels on sublanes and a lane-dense pixel axis inside the kernel.
    x2d = jnp.transpose(inp, (1, 0, 2, 3)).reshape(C, N * HW)

    slab, layout = _pack_param_slab(params)

    # Explicit VMEM budget: rough per-step live set (f32) incl. double-buffered
    # IO; clamped to stay within every generation's physical VMEM.
    DW = int(params["w1"].shape[0])
    FFN = int(params["w4"].shape[0])
    est = 4 * P * (4 * C + 2 * DW + FFN + 8)
    vmem_limit = int(min(max(est, 16 << 20), 48 << 20))

    kernel = functools.partial(nafblock_kernel, H, W, B, layout)

    out2d = pl.pallas_call(
        kernel,
        out_shape=jax.ShapeDtypeStruct((C, N * HW), inp.dtype),
        grid_spec=pltpu.PrefetchScalarGridSpec(
            num_scalar_prefetch=0,
            grid=(grid,),
            in_specs=[pl.BlockSpec((C, P), lambda i: (0, i)),
                      pl.BlockSpec(slab.shape, lambda i: (0, 0))],
            out_specs=pl.BlockSpec((C, P), lambda i: (0, i)),
        ),
        compiler_params=pltpu.CompilerParams(
            dimension_semantics=("parallel",),
            vmem_limit_bytes=vmem_limit),
    )(x2d, slab)

    return jnp.transpose(out2d.reshape(C, N, H, W), (1, 0, 2, 3))


def init_params(key, c, dw_expand=2, ffn_expand=2):
    """Parameters in the kernel's matmul-friendly (Cout, Cin) layout."""
    dw = c * dw_expand
    dwh = dw // 2
    ffn = c * ffn_expand
    ffnh = ffn // 2
    ks = jax.random.split(key, 16)
    n = lambda k, shape, s=0.1: (s * jax.random.normal(k, shape)).astype(jnp.float32)
    return {
        "n1w": n(ks[0], (c, 1)) + 1.0, "n1b": n(ks[1], (c, 1)),
        "w1": n(ks[2], (dw, c)),       "b1": n(ks[3], (dw, 1)),
        "w2": n(ks[4], (dw, 9)),       "b2": n(ks[5], (dw, 1)),
        "scaw": n(ks[6], (dwh, dwh)),  "scab": n(ks[7], (dwh, 1)),
        "w3": n(ks[8], (c, dwh)),      "b3": n(ks[9], (c, 1)),
        "beta": n(ks[10], (c, 1)),
        "n2w": n(ks[11], (c, 1)) + 1.0, "n2b": n(ks[12], (c, 1)),
        "w4": n(ks[13], (ffn, c)),     "b4": n(ks[14], (ffn, 1)),
        "w5": n(ks[15], (c, ffnh)),    "b5": jnp.zeros((c, 1), jnp.float32),
        "gamma": jnp.full((c, 1), 0.05, jnp.float32),
    }


def nafblock_ref(inp, p):
    """Pure-JAX NCHW reference mirroring the PyTorch forward."""
    DW = p["w1"].shape[0]

    def ln(x, w, b):
        mu = x.mean(axis=1, keepdims=True)
        var = ((x - mu) ** 2).mean(axis=1, keepdims=True)
        return ((x - mu) / jnp.sqrt(var + EPS)) * w.reshape(1, -1, 1, 1) \
            + b.reshape(1, -1, 1, 1)

    def conv1x1(x, w, b):
        return jnp.einsum("nchw,dc->ndhw", x, w) + b.reshape(1, -1, 1, 1)

    x = ln(inp, p["n1w"], p["n1b"])
    x = conv1x1(x, p["w1"], p["b1"])
    dw_w = p["w2"].reshape(DW, 1, 3, 3)
    x = jax.lax.conv_general_dilated(
        x, dw_w, window_strides=(1, 1), padding="SAME",
        dimension_numbers=("NCHW", "OIHW", "NCHW"),
        feature_group_count=DW) + p["b2"].reshape(1, -1, 1, 1)
    x1, x2 = jnp.split(x, 2, axis=1)
    x = x1 * x2
    pooled = x.mean(axis=(2, 3), keepdims=True)
    s = jnp.einsum("nchw,dc->ndhw", pooled, p["scaw"]) + p["scab"].reshape(1, -1, 1, 1)
    x = x * s
    x = conv1x1(x, p["w3"], p["b3"])
    y = inp + x * p["beta"].reshape(1, -1, 1, 1)
    x = ln(y, p["n2w"], p["n2b"])
    x = conv1x1(x, p["w4"], p["b4"])
    x1, x2 = jnp.split(x, 2, axis=1)
    x = x1 * x2
    x = conv1x1(x, p["w5"], p["b5"])
    return y + x * p["gamma"].reshape(1, -1, 1, 1)


if __name__ == "__main__":
    N, C, H, W = 2, 4, 16, 16            # module-native NCHW input
    key = jax.random.PRNGKey(0)
    k_inp, k_par = jax.random.split(key)
    inp = jax.random.normal(k_inp, (N, C, H, W), dtype=jnp.float32)
    params = init_params(k_par, C)

    # drop_out_rate = 0.0 -> dropout1/dropout2 are Identity (nothing to do).
    out = jax.block_until_ready(nafblock(inp, params))
    ref = jax.block_until_ready(nafblock_ref(inp, params))

    assert out.shape == (N, C, H, W)
    max_err = float(jnp.max(jnp.abs(out - ref)))
    assert jnp.allclose(out, ref, rtol=1e-4, atol=1e-4), max_err
    print("KERNEL_OK")
</pallas_src>

<mosaic_0001>
module attributes {stable_mosaic.version = 11 : i64} {
  func.func @nafblock_kernel(%arg0: i32, %arg1: memref<4x256xf32, #tpu.memory_space<vmem>>, %arg2: memref<144x9xf32, #tpu.memory_space<vmem>>, %arg3: memref<4x256xf32, #tpu.memory_space<vmem>>) attributes {dimension_semantics = [#tpu.dimension_semantics<parallel>], iteration_bounds = array<i64: 2>, scalar_prefetch = 0 : i64, scratch_operands = 0 : i64, tpu.core_type = #tpu.core_type<tc>, window_params = [{transform_indices = @transform_0, window_bounds = array<i64: 4, 256>}, {pipeline_mode = #tpu.pipeline_mode<synchronous>, transform_indices = @transform_1, window_bounds = array<i64: 144, 9>}, {transform_indices = @transform_2, window_bounds = array<i64: 4, 256>}]} {
    %c0 = arith.constant 0 : index
    %c0_0 = arith.constant 0 : index
    %0 = vector.load %arg2[%c0, %c0_0] : memref<144x9xf32, #tpu.memory_space<vmem>>, vector<4x1xf32>
    %c8 = arith.constant 8 : index
    %c0_1 = arith.constant 0 : index
    %1 = vector.load %arg2[%c8, %c0_1] : memref<144x9xf32, #tpu.memory_space<vmem>>, vector<4x1xf32>
    %c16 = arith.constant 16 : index
    %c0_2 = arith.constant 0 : index
    %2 = vector.load %arg2[%c16, %c0_2] : memref<144x9xf32, #tpu.memory_space<vmem>>, vector<8x4xf32>
    %c24 = arith.constant 24 : index
    %c0_3 = arith.constant 0 : index
    %3 = vector.load %arg2[%c24, %c0_3] : memref<144x9xf32, #tpu.memory_space<vmem>>, vector<8x1xf32>
    %c32 = arith.constant 32 : index
    %c0_4 = arith.constant 0 : index
    %4 = vector.load %arg2[%c32, %c0_4] : memref<144x9xf32, #tpu.memory_space<vmem>>, vector<8x9xf32>
    %c40 = arith.constant 40 : index
    %c0_5 = arith.constant 0 : index
    %5 = vector.load %arg2[%c40, %c0_5] : memref<144x9xf32, #tpu.memory_space<vmem>>, vector<8x1xf32>
    %c48 = arith.constant 48 : index
    %c0_6 = arith.constant 0 : index
    %6 = vector.load %arg2[%c48, %c0_6] : memref<144x9xf32, #tpu.memory_space<vmem>>, vector<4x4xf32>
    %c56 = arith.constant 56 : index
    %c0_7 = arith.constant 0 : index
    %7 = vector.load %arg2[%c56, %c0_7] : memref<144x9xf32, #tpu.memory_space<vmem>>, vector<4x1xf32>
    %c64 = arith.constant 64 : index
    %c0_8 = arith.constant 0 : index
    %8 = vector.load %arg2[%c64, %c0_8] : memref<144x9xf32, #tpu.memory_space<vmem>>, vector<4x4xf32>
    %c72 = arith.constant 72 : index
    %c0_9 = arith.constant 0 : index
    %9 = vector.load %arg2[%c72, %c0_9] : memref<144x9xf32, #tpu.memory_space<vmem>>, vector<4x1xf32>
    %c80 = arith.constant 80 : index
    %c0_10 = arith.constant 0 : index
    %10 = vector.load %arg2[%c80, %c0_10] : memref<144x9xf32, #tpu.memory_space<vmem>>, vector<4x1xf32>
    %c88 = arith.constant 88 : index
    %c0_11 = arith.constant 0 : index
    %11 = vector.load %arg2[%c88, %c0_11] : memref<144x9xf32, #tpu.memory_space<vmem>>, vector<4x1xf32>
    %c96 = arith.constant 96 : index
    %c0_12 = arith.constant 0 : index
    %12 = vector.load %arg2[%c96, %c0_12] : memref<144x9xf32, #tpu.memory_space<vmem>>, vector<4x1xf32>
    %c104 = arith.constant 104 : index
    %c0_13 = arith.constant 0 : index
    %13 = vector.load %arg2[%c104, %c0_13] : memref<144x9xf32, #tpu.memory_space<vmem>>, vector<8x4xf32>
    %c112 = arith.constant 112 : index
    %c0_14 = arith.constant 0 : index
    %14 = vector.load %arg2[%c112, %c0_14] : memref<144x9xf32, #tpu.memory_space<vmem>>, vector<8x1xf32>
    %c120 = arith.constant 120 : index
    %c0_15 = arith.constant 0 : index
    %15 = vector.load %arg2[%c120, %c0_15] : memref<144x9xf32, #tpu.memory_space<vmem>>, vector<4x4xf32>
    %c128 = arith.constant 128 : index
    %c0_16 = arith.constant 0 : index
    %16 = vector.load %arg2[%c128, %c0_16] : memref<144x9xf32, #tpu.memory_space<vmem>>, vector<4x1xf32>
    %c136 = arith.constant 136 : index
    %c0_17 = arith.constant 0 : index
    %17 = vector.load %arg2[%c136, %c0_17] : memref<144x9xf32, #tpu.memory_space<vmem>>, vector<4x1xf32>
    %c0_18 = arith.constant 0 : index
    %c0_19 = arith.constant 0 : index
    %18 = vector.load %arg1[%c0_18, %c0_19] : memref<4x256xf32, #tpu.memory_space<vmem>>, vector<4x256xf32>
    %19 = tpu.iota {dimensions = array<i32: 1>} : vector<1x256xi32>
    %c15_i32 = arith.constant 15 : i32
    %20 = vector.broadcast %c15_i32 : i32 to vector<1x256xi32>
    %21 = arith.andi %19, %20 : vector<1x256xi32>
    %c255_i32 = arith.constant 255 : i32
    %22 = vector.broadcast %c255_i32 : i32 to vector<1x256xi32>
    %23 = arith.andi %19, %22 : vector<1x256xi32>
    %c1_i32 = arith.constant 1 : i32
    %24 = vector.broadcast %c1_i32 : i32 to vector<1x256xi32>
    %25 = arith.cmpi sge, %21, %24 : vector<1x256xi32>
    %cst = arith.constant 1.000000e+00 : f32
    %cst_20 = arith.constant 0.000000e+00 : f32
    %26 = vector.broadcast %cst : f32 to vector<1x256xf32>
    %27 = vector.broadcast %cst_20 : f32 to vector<1x256xf32>
    %28 = arith.select %25, %26, %27 : vector<1x256xi1>, vector<1x256xf32>
    %c15_i32_21 = arith.constant 15 : i32
    %29 = vector.broadcast %c15_i32_21 : i32 to vector<1x256xi32>
    %30 = arith.cmpi slt, %21, %29 : vector<1x256xi32>
    %cst_22 = arith.constant 1.000000e+00 : f32
    %cst_23 = arith.constant 0.000000e+00 : f32
    %31 = vector.broadcast %cst_22 : f32 to vector<1x256xf32>
    %32 = vector.broadcast %cst_23 : f32 to vector<1x256xf32>
    %33 = arith.select %30, %31, %32 : vector<1x256xi1>, vector<1x256xf32>
    %c16_i32 = arith.constant 16 : i32
    %34 = vector.broadcast %c16_i32 : i32 to vector<1x256xi32>
    %35 = arith.cmpi sge, %23, %34 : vector<1x256xi32>
    %cst_24 = arith.constant 1.000000e+00 : f32
    %cst_25 = arith.constant 0.000000e+00 : f32
    %36 = vector.broadcast %cst_24 : f32 to vector<1x256xf32>
    %37 = vector.broadcast %cst_25 : f32 to vector<1x256xf32>
    %38 = arith.select %35, %36, %37 : vector<1x256xi1>, vector<1x256xf32>
    %c240_i32 = arith.constant 240 : i32
    %39 = vector.broadcast %c240_i32 : i32 to vector<1x256xi32>
    %40 = arith.cmpi slt, %23, %39 : vector<1x256xi32>
    %cst_26 = arith.constant 1.000000e+00 : f32
    %cst_27 = arith.constant 0.000000e+00 : f32
    %41 = vector.broadcast %cst_26 : f32 to vector<1x256xf32>
    %42 = vector.broadcast %cst_27 : f32 to vector<1x256xf32>
    %43 = arith.select %40, %41, %42 : vector<1x256xi1>, vector<1x256xf32>
    %cst_28 = arith.constant dense<0.000000e+00> : vector<256xf32>
    %44 = vector.multi_reduction <add>, %18, %cst_28 [0] : vector<4x256xf32> to vector<256xf32>
    %45 = vector.shape_cast %44 : vector<256xf32> to vector<1x256xf32>
    %cst_29 = arith.constant 2.500000e-01 : f32
    %46 = vector.broadcast %cst_29 : f32 to vector<1x256xf32>
    %47 = arith.mulf %45, %46 : vector<1x256xf32>
    %48 = vector.broadcast %47 : vector<1x256xf32> to vector<4x256xf32>
    %49 = arith.subf %18, %48 : vector<4x256xf32>
    %50 = arith.mulf %49, %49 : vector<4x256xf32>
    %cst_30 = arith.constant dense<0.000000e+00> : vector<256xf32>
    %51 = vector.multi_reduction <add>, %50, %cst_30 [0] : vector<4x256xf32> to vector<256xf32>
    %52 = vector.shape_cast %51 : vector<256xf32> to vector<1x256xf32>
    %cst_31 = arith.constant 2.500000e-01 : f32
    %53 = vector.broadcast %cst_31 : f32 to vector<1x256xf32>
    %54 = arith.mulf %52, %53 : vector<1x256xf32>
    %cst_32 = arith.constant 9.99999997E-7 : f32
    %55 = vector.broadcast %cst_32 : f32 to vector<1x256xf32>
    %56 = arith.addf %54, %55 : vector<1x256xf32>
    %57 = math.rsqrt %56 : vector<1x256xf32>
    %58 = vector.broadcast %57 : vector<1x256xf32> to vector<4x256xf32>
    %59 = arith.mulf %49, %58 : vector<4x256xf32>
    %60 = vector.broadcast %0 : vector<4x1xf32> to vector<4x256xf32>
    %61 = arith.mulf %59, %60 : vector<4x256xf32>
    %62 = vector.broadcast %1 : vector<4x1xf32> to vector<4x256xf32>
    %63 = arith.addf %61, %62 : vector<4x256xf32>
    %64 = vector.extract_strided_slice %2 {offsets = [0, 0], sizes = [8, 1], strides = [1, 1]} : vector<8x4xf32> to vector<8x1xf32>
    %65 = vector.extract_strided_slice %63 {offsets = [0, 0], sizes = [1, 256], strides = [1, 1]} : vector<4x256xf32> to vector<1x256xf32>
    %66 = vector.broadcast %64 : vector<8x1xf32> to vector<8x256xf32>
    %67 = vector.broadcast %65 : vector<1x256xf32> to vector<8x256xf32>
    %68 = arith.mulf %66, %67 : vector<8x256xf32>
    %69 = vector.extract_strided_slice %2 {offsets = [0, 1], sizes = [8, 1], strides = [1, 1]} : vector<8x4xf32> to vector<8x1xf32>
    %70 = vector.extract_strided_slice %63 {offsets = [1, 0], sizes = [1, 256], strides = [1, 1]} : vector<4x256xf32> to vector<1x256xf32>
    %71 = vector.broadcast %69 : vector<8x1xf32> to vector<8x256xf32>
    %72 = vector.broadcast %70 : vector<1x256xf32> to vector<8x256xf32>
    %73 = arith.mulf %71, %72 : vector<8x256xf32>
    %74 = arith.addf %68, %73 : vector<8x256xf32>
    %75 = vector.extract_strided_slice %2 {offsets = [0, 2], sizes = [8, 1], strides = [1, 1]} : vector<8x4xf32> to vector<8x1xf32>
    %76 = vector.extract_strided_slice %63 {offsets = [2, 0], sizes = [1, 256], strides = [1, 1]} : vector<4x256xf32> to vector<1x256xf32>
    %77 = vector.broadcast %75 : vector<8x1xf32> to vector<8x256xf32>
    %78 = vector.broadcast %76 : vector<1x256xf32> to vector<8x256xf32>
    %79 = arith.mulf %77, %78 : vector<8x256xf32>
    %80 = arith.addf %74, %79 : vector<8x256xf32>
    %81 = vector.extract_strided_slice %2 {offsets = [0, 3], sizes = [8, 1], strides = [1, 1]} : vector<8x4xf32> to vector<8x1xf32>
    %82 = vector.extract_strided_slice %63 {offsets = [3, 0], sizes = [1, 256], strides = [1, 1]} : vector<4x256xf32> to vector<1x256xf32>
    %83 = vector.broadcast %81 : vector<8x1xf32> to vector<8x256xf32>
    %84 = vector.broadcast %82 : vector<1x256xf32> to vector<8x256xf32>
    %85 = arith.mulf %83, %84 : vector<8x256xf32>
    %86 = arith.addf %80, %85 : vector<8x256xf32>
    %87 = vector.broadcast %3 : vector<8x1xf32> to vector<8x256xf32>
    %88 = arith.addf %86, %87 : vector<8x256xf32>
    %c17_i32 = arith.constant 17 : i32
    %89 = tpu.dynamic_rotate %88 by %c17_i32 dim 1 : vector<8x256xf32>, i32 -> vector<8x256xf32>
    %90 = arith.mulf %38, %28 : vector<1x256xf32>
    %91 = vector.broadcast %90 : vector<1x256xf32> to vector<8x256xf32>
    %92 = arith.mulf %91, %89 : vector<8x256xf32>
    %93 = vector.extract_strided_slice %4 {offsets = [0, 0], sizes = [8, 1], strides = [1, 1]} : vector<8x9xf32> to vector<8x1xf32>
    %94 = vector.broadcast %93 : vector<8x1xf32> to vector<8x256xf32>
    %95 = arith.mulf %94, %92 : vector<8x256xf32>
    %c16_i32_33 = arith.constant 16 : i32
    %96 = tpu.dynamic_rotate %88 by %c16_i32_33 dim 1 : vector<8x256xf32>, i32 -> vector<8x256xf32>
    %97 = vector.broadcast %38 : vector<1x256xf32> to vector<8x256xf32>
    %98 = arith.mulf %97, %96 : vector<8x256xf32>
    %99 = vector.extract_strided_slice %4 {offsets = [0, 1], sizes = [8, 1], strides = [1, 1]} : vector<8x9xf32> to vector<8x1xf32>
    %100 = vector.broadcast %99 : vector<8x1xf32> to vector<8x256xf32>
    %101 = arith.mulf %100, %98 : vector<8x256xf32>
    %102 = arith.addf %95, %101 : vector<8x256xf32>
    %c15_i32_34 = arith.constant 15 : i32
    %103 = tpu.dynamic_rotate %88 by %c15_i32_34 dim 1 : vector<8x256xf32>, i32 -> vector<8x256xf32>
    %104 = arith.mulf %38, %33 : vector<1x256xf32>
    %105 = vector.broadcast %104 : vector<1x256xf32> to vector<8x256xf32>
    %106 = arith.mulf %105, %103 : vector<8x256xf32>
    %107 = vector.extract_strided_slice %4 {offsets = [0, 2], sizes = [8, 1], strides = [1, 1]} : vector<8x9xf32> to vector<8x1xf32>
    %108 = vector.broadcast %107 : vector<8x1xf32> to vector<8x256xf32>
    %109 = arith.mulf %108, %106 : vector<8x256xf32>
    %110 = arith.addf %102, %109 : vector<8x256xf32>
    %c1_i32_35 = arith.constant 1 : i32
    %111 = tpu.dynamic_rotate %88 by %c1_i32_35 dim 1 : vector<8x256xf32>, i32 -> vector<8x256xf32>
    %112 = vector.broadcast %28 : vector<1x256xf32> to vector<8x256xf32>
    %113 = arith.mulf %112, %111 : vector<8x256xf32>
    %114 = vector.extract_strided_slice %4 {offsets = [0, 3], sizes = [8, 1], strides = [1, 1]} : vector<8x9xf32> to vector<8x1xf32>
    %115 = vector.broadcast %114 : vector<8x1xf32> to vector<8x256xf32>
    %116 = arith.mulf %115, %113 : vector<8x256xf32>
    %117 = arith.addf %110, %116 : vector<8x256xf32>
    %118 = vector.extract_strided_slice %4 {offsets = [0, 4], sizes = [8, 1], strides = [1, 1]} : vector<8x9xf32> to vector<8x1xf32>
    %119 = vector.broadcast %118 : vector<8x1xf32> to vector<8x256xf32>
    %120 = arith.mulf %119, %88 : vector<8x256xf32>
    %121 = arith.addf %117, %120 : vector<8x256xf32>
    %c255_i32_36 = arith.constant 255 : i32
    %122 = tpu.dynamic_rotate %88 by %c255_i32_36 dim 1 : vector<8x256xf32>, i32 -> vector<8x256xf32>
    %123 = vector.broadcast %33 : vector<1x256xf32> to vector<8x256xf32>
    %124 = arith.mulf %123, %122 : vector<8x256xf32>
    %125 = vector.extract_strided_slice %4 {offsets = [0, 5], sizes = [8, 1], strides = [1, 1]} : vector<8x9xf32> to vector<8x1xf32>
    %126 = vector.broadcast %125 : vector<8x1xf32> to vector<8x256xf32>
    %127 = arith.mulf %126, %124 : vector<8x256xf32>
    %128 = arith.addf %121, %127 : vector<8x256xf32>
    %c241_i32 = arith.constant 241 : i32
    %129 = tpu.dynamic_rotate %88 by %c241_i32 dim 1 : vector<8x256xf32>, i32 -> vector<8x256xf32>
    %130 = arith.mulf %43, %28 : vector<1x256xf32>
    %131 = vector.broadcast %130 : vector<1x256xf32> to vector<8x256xf32>
    %132 = arith.mulf %131, %129 : vector<8x256xf32>
    %133 = vector.extract_strided_slice %4 {offsets = [0, 6], sizes = [8, 1], strides = [1, 1]} : vector<8x9xf32> to vector<8x1xf32>
    %134 = vector.broadcast %133 : vector<8x1xf32> to vector<8x256xf32>
    %135 = arith.mulf %134, %132 : vector<8x256xf32>
    %136 = arith.addf %128, %135 : vector<8x256xf32>
    %c240_i32_37 = arith.constant 240 : i32
    %137 = tpu.dynamic_rotate %88 by %c240_i32_37 dim 1 : vector<8x256xf32>, i32 -> vector<8x256xf32>
    %138 = vector.broadcast %43 : vector<1x256xf32> to vector<8x256xf32>
    %139 = arith.mulf %138, %137 : vector<8x256xf32>
    %140 = vector.extract_strided_slice %4 {offsets = [0, 7], sizes = [8, 1], strides = [1, 1]} : vector<8x9xf32> to vector<8x1xf32>
    %141 = vector.broadcast %140 : vector<8x1xf32> to vector<8x256xf32>
    %142 = arith.mulf %141, %139 : vector<8x256xf32>
    %143 = arith.addf %136, %142 : vector<8x256xf32>
    %c239_i32 = arith.constant 239 : i32
    %144 = tpu.dynamic_rotate %88 by %c239_i32 dim 1 : vector<8x256xf32>, i32 -> vector<8x256xf32>
    %145 = arith.mulf %43, %33 : vector<1x256xf32>
    %146 = vector.broadcast %145 : vector<1x256xf32> to vector<8x256xf32>
    %147 = arith.mulf %146, %144 : vector<8x256xf32>
    %148 = vector.extract_strided_slice %4 {offsets = [0, 8], sizes = [8, 1], strides = [1, 1]} : vector<8x9xf32> to vector<8x1xf32>
    %149 = vector.broadcast %148 : vector<8x1xf32> to vector<8x256xf32>
    %150 = arith.mulf %149, %147 : vector<8x256xf32>
    %151 = arith.addf %143, %150 : vector<8x256xf32>
    %152 = vector.broadcast %5 : vector<8x1xf32> to vector<8x256xf32>
    %153 = arith.addf %151, %152 : vector<8x256xf32>
    %154 = vector.extract_strided_slice %153 {offsets = [0, 0], sizes = [4, 256], strides = [1, 1]} : vector<8x256xf32> to vector<4x256xf32>
    %155 = vector.extract_strided_slice %153 {offsets = [4, 0], sizes = [4, 256], strides = [1, 1]} : vector<8x256xf32> to vector<4x256xf32>
    %156 = arith.mulf %154, %155 : vector<4x256xf32>
    %cst_38 = arith.constant dense<0.000000e+00> : vector<4xf32>
    %157 = vector.multi_reduction <add>, %156, %cst_38 [1] : vector<4x256xf32> to vector<4xf32>
    %158 = vector.shape_cast %157 : vector<4xf32> to vector<4x1xf32>
    %cst_39 = arith.constant 2.560000e+02 : f32
    %159 = vector.broadcast %cst_39 : f32 to vector<4x1xf32>
    %160 = arith.divf %158, %159 : vector<4x1xf32>
    %161 = vector.extract_strided_slice %6 {offsets = [0, 0], sizes = [4, 1], strides = [1, 1]} : vector<4x4xf32> to vector<4x1xf32>
    %162 = vector.extract_strided_slice %160 {offsets = [0, 0], sizes = [1, 1], strides = [1, 1]} : vector<4x1xf32> to vector<1x1xf32>
    %163 = vector.broadcast %162 : vector<1x1xf32> to vector<4x1xf32>
    %164 = arith.mulf %161, %163 : vector<4x1xf32>
    %165 = vector.extract_strided_slice %6 {offsets = [0, 1], sizes = [4, 1], strides = [1, 1]} : vector<4x4xf32> to vector<4x1xf32>
    %166 = vector.extract_strided_slice %160 {offsets = [1, 0], sizes = [1, 1], strides = [1, 1]} : vector<4x1xf32> to vector<1x1xf32>
    %167 = vector.broadcast %166 : vector<1x1xf32> to vector<4x1xf32>
    %168 = arith.mulf %165, %167 : vector<4x1xf32>
    %169 = arith.addf %164, %168 : vector<4x1xf32>
    %170 = vector.extract_strided_slice %6 {offsets = [0, 2], sizes = [4, 1], strides = [1, 1]} : vector<4x4xf32> to vector<4x1xf32>
    %171 = vector.extract_strided_slice %160 {offsets = [2, 0], sizes = [1, 1], strides = [1, 1]} : vector<4x1xf32> to vector<1x1xf32>
    %172 = vector.broadcast %171 : vector<1x1xf32> to vector<4x1xf32>
    %173 = arith.mulf %170, %172 : vector<4x1xf32>
    %174 = arith.addf %169, %173 : vector<4x1xf32>
    %175 = vector.extract_strided_slice %6 {offsets = [0, 3], sizes = [4, 1], strides = [1, 1]} : vector<4x4xf32> to vector<4x1xf32>
    %176 = vector.extract_strided_slice %160 {offsets = [3, 0], sizes = [1, 1], strides = [1, 1]} : vector<4x1xf32> to vector<1x1xf32>
    %177 = vector.broadcast %176 : vector<1x1xf32> to vector<4x1xf32>
    %178 = arith.mulf %175, %177 : vector<4x1xf32>
    %179 = arith.addf %174, %178 : vector<4x1xf32>
    %180 = arith.addf %179, %7 : vector<4x1xf32>
    %181 = vector.broadcast %180 : vector<4x1xf32> to vector<4x256xf32>
    %182 = arith.mulf %156, %181 : vector<4x256xf32>
    %183 = vector.extract_strided_slice %8 {offsets = [0, 0], sizes = [4, 1], strides = [1, 1]} : vector<4x4xf32> to vector<4x1xf32>
    %184 = vector.extract_strided_slice %182 {offsets = [0, 0], sizes = [1, 256], strides = [1, 1]} : vector<4x256xf32> to vector<1x256xf32>
    %185 = vector.broadcast %183 : vector<4x1xf32> to vector<4x256xf32>
    %186 = vector.broadcast %184 : vector<1x256xf32> to vector<4x256xf32>
    %187 = arith.mulf %185, %186 : vector<4x256xf32>
    %188 = vector.extract_strided_slice %8 {offsets = [0, 1], sizes = [4, 1], strides = [1, 1]} : vector<4x4xf32> to vector<4x1xf32>
    %189 = vector.extract_strided_slice %182 {offsets = [1, 0], sizes = [1, 256], strides = [1, 1]} : vector<4x256xf32> to vector<1x256xf32>
    %190 = vector.broadcast %188 : vector<4x1xf32> to vector<4x256xf32>
    %191 = vector.broadcast %189 : vector<1x256xf32> to vector<4x256xf32>
    %192 = arith.mulf %190, %191 : vector<4x256xf32>
    %193 = arith.addf %187, %192 : vector<4x256xf32>
    %194 = vector.extract_strided_slice %8 {offsets = [0, 2], sizes = [4, 1], strides = [1, 1]} : vector<4x4xf32> to vector<4x1xf32>
    %195 = vector.extract_strided_slice %182 {offsets = [2, 0], sizes = [1, 256], strides = [1, 1]} : vector<4x256xf32> to vector<1x256xf32>
    %196 = vector.broadcast %194 : vector<4x1xf32> to vector<4x256xf32>
    %197 = vector.broadcast %195 : vector<1x256xf32> to vector<4x256xf32>
    %198 = arith.mulf %196, %197 : vector<4x256xf32>
    %199 = arith.addf %193, %198 : vector<4x256xf32>
    %200 = vector.extract_strided_slice %8 {offsets = [0, 3], sizes = [4, 1], strides = [1, 1]} : vector<4x4xf32> to vector<4x1xf32>
    %201 = vector.extract_strided_slice %182 {offsets = [3, 0], sizes = [1, 256], strides = [1, 1]} : vector<4x256xf32> to vector<1x256xf32>
    %202 = vector.broadcast %200 : vector<4x1xf32> to vector<4x256xf32>
    %203 = vector.broadcast %201 : vector<1x256xf32> to vector<4x256xf32>
    %204 = arith.mulf %202, %203 : vector<4x256xf32>
    %205 = arith.addf %199, %204 : vector<4x256xf32>
    %206 = vector.broadcast %9 : vector<4x1xf32> to vector<4x256xf32>
    %207 = arith.addf %205, %206 : vector<4x256xf32>
    %208 = vector.broadcast %10 : vector<4x1xf32> to vector<4x256xf32>
    %209 = arith.mulf %207, %208 : vector<4x256xf32>
    %210 = arith.addf %18, %209 : vector<4x256xf32>
    %cst_40 = arith.constant dense<0.000000e+00> : vector<256xf32>
    %211 = vector.multi_reduction <add>, %210, %cst_40 [0] : vector<4x256xf32> to vector<256xf32>
    %212 = vector.shape_cast %211 : vector<256xf32> to vector<1x256xf32>
    %cst_41 = arith.constant 2.500000e-01 : f32
    %213 = vector.broadcast %cst_41 : f32 to vector<1x256xf32>
    %214 = arith.mulf %212, %213 : vector<1x256xf32>
    %215 = vector.broadcast %214 : vector<1x256xf32> to vector<4x256xf32>
    %216 = arith.subf %210, %215 : vector<4x256xf32>
    %217 = arith.mulf %216, %216 : vector<4x256xf32>
    %cst_42 = arith.constant dense<0.000000e+00> : vector<256xf32>
    %218 = vector.multi_reduction <add>, %217, %cst_42 [0] : vector<4x256xf32> to vector<256xf32>
    %219 = vector.shape_cast %218 : vector<256xf32> to vector<1x256xf32>
    %cst_43 = arith.constant 2.500000e-01 : f32
    %220 = vector.broadcast %cst_43 : f32 to vector<1x256xf32>
    %221 = arith.mulf %219, %220 : vector<1x256xf32>
    %cst_44 = arith.constant 9.99999997E-7 : f32
    %222 = vector.broadcast %cst_44 : f32 to vector<1x256xf32>
    %223 = arith.addf %221, %222 : vector<1x256xf32>
    %224 = math.rsqrt %223 : vector<1x256xf32>
    %225 = vector.broadcast %224 : vector<1x256xf32> to vector<4x256xf32>
    %226 = arith.mulf %216, %225 : vector<4x256xf32>
    %227 = vector.broadcast %11 : vector<4x1xf32> to vector<4x256xf32>
    %228 = arith.mulf %226, %227 : vector<4x256xf32>
    %229 = vector.broadcast %12 : vector<4x1xf32> to vector<4x256xf32>
    %230 = arith.addf %228, %229 : vector<4x256xf32>
    %231 = vector.extract_strided_slice %13 {offsets = [0, 0], sizes = [8, 1], strides = [1, 1]} : vector<8x4xf32> to vector<8x1xf32>
    %232 = vector.extract_strided_slice %230 {offsets = [0, 0], sizes = [1, 256], strides = [1, 1]} : vector<4x256xf32> to vector<1x256xf32>
    %233 = vector.broadcast %231 : vector<8x1xf32> to vector<8x256xf32>
    %234 = vector.broadcast %232 : vector<1x256xf32> to vector<8x256xf32>
    %235 = arith.mulf %233, %234 : vector<8x256xf32>
    %236 = vector.extract_strided_slice %13 {offsets = [0, 1], sizes = [8, 1], strides = [1, 1]} : vector<8x4xf32> to vector<8x1xf32>
    %237 = vector.extract_strided_slice %230 {offsets = [1, 0], sizes = [1, 256], strides = [1, 1]} : vector<4x256xf32> to vector<1x256xf32>
    %238 = vector.broadcast %236 : vector<8x1xf32> to vector<8x256xf32>
    %239 = vector.broadcast %237 : vector<1x256xf32> to vector<8x256xf32>
    %240 = arith.mulf %238, %239 : vector<8x256xf32>
    %241 = arith.addf %235, %240 : vector<8x256xf32>
    %242 = vector.extract_strided_slice %13 {offsets = [0, 2], sizes = [8, 1], strides = [1, 1]} : vector<8x4xf32> to vector<8x1xf32>
    %243 = vector.extract_strided_slice %230 {offsets = [2, 0], sizes = [1, 256], strides = [1, 1]} : vector<4x256xf32> to vector<1x256xf32>
    %244 = vector.broadcast %242 : vector<8x1xf32> to vector<8x256xf32>
    %245 = vector.broadcast %243 : vector<1x256xf32> to vector<8x256xf32>
    %246 = arith.mulf %244, %245 : vector<8x256xf32>
    %247 = arith.addf %241, %246 : vector<8x256xf32>
    %248 = vector.extract_strided_slice %13 {offsets = [0, 3], sizes = [8, 1], strides = [1, 1]} : vector<8x4xf32> to vector<8x1xf32>
    %249 = vector.extract_strided_slice %230 {offsets = [3, 0], sizes = [1, 256], strides = [1, 1]} : vector<4x256xf32> to vector<1x256xf32>
    %250 = vector.broadcast %248 : vector<8x1xf32> to vector<8x256xf32>
    %251 = vector.broadcast %249 : vector<1x256xf32> to vector<8x256xf32>
    %252 = arith.mulf %250, %251 : vector<8x256xf32>
    %253 = arith.addf %247, %252 : vector<8x256xf32>
    %254 = vector.broadcast %14 : vector<8x1xf32> to vector<8x256xf32>
    %255 = arith.addf %253, %254 : vector<8x256xf32>
    %256 = vector.extract_strided_slice %255 {offsets = [0, 0], sizes = [4, 256], strides = [1, 1]} : vector<8x256xf32> to vector<4x256xf32>
    %257 = vector.extract_strided_slice %255 {offsets = [4, 0], sizes = [4, 256], strides = [1, 1]} : vector<8x256xf32> to vector<4x256xf32>
    %258 = arith.mulf %256, %257 : vector<4x256xf32>
    %259 = vector.extract_strided_slice %15 {offsets = [0, 0], sizes = [4, 1], strides = [1, 1]} : vector<4x4xf32> to vector<4x1xf32>
    %260 = vector.extract_strided_slice %258 {offsets = [0, 0], sizes = [1, 256], strides = [1, 1]} : vector<4x256xf32> to vector<1x256xf32>
    %261 = vector.broadcast %259 : vector<4x1xf32> to vector<4x256xf32>
    %262 = vector.broadcast %260 : vector<1x256xf32> to vector<4x256xf32>
    %263 = arith.mulf %261, %262 : vector<4x256xf32>
    %264 = vector.extract_strided_slice %15 {offsets = [0, 1], sizes = [4, 1], strides = [1, 1]} : vector<4x4xf32> to vector<4x1xf32>
    %265 = vector.extract_strided_slice %258 {offsets = [1, 0], sizes = [1, 256], strides = [1, 1]} : vector<4x256xf32> to vector<1x256xf32>
    %266 = vector.broadcast %264 : vector<4x1xf32> to vector<4x256xf32>
    %267 = vector.broadcast %265 : vector<1x256xf32> to vector<4x256xf32>
    %268 = arith.mulf %266, %267 : vector<4x256xf32>
    %269 = arith.addf %263, %268 : vector<4x256xf32>
    %270 = vector.extract_strided_slice %15 {offsets = [0, 2], sizes = [4, 1], strides = [1, 1]} : vector<4x4xf32> to vector<4x1xf32>
    %271 = vector.extract_strided_slice %258 {offsets = [2, 0], sizes = [1, 256], strides = [1, 1]} : vector<4x256xf32> to vector<1x256xf32>
    %272 = vector.broadcast %270 : vector<4x1xf32> to vector<4x256xf32>
    %273 = vector.broadcast %271 : vector<1x256xf32> to vector<4x256xf32>
    %274 = arith.mulf %272, %273 : vector<4x256xf32>
    %275 = arith.addf %269, %274 : vector<4x256xf32>
    %276 = vector.extract_strided_slice %15 {offsets = [0, 3], sizes = [4, 1], strides = [1, 1]} : vector<4x4xf32> to vector<4x1xf32>
    %277 = vector.extract_strided_slice %258 {offsets = [3, 0], sizes = [1, 256], strides = [1, 1]} : vector<4x256xf32> to vector<1x256xf32>
    %278 = vector.broadcast %276 : vector<4x1xf32> to vector<4x256xf32>
    %279 = vector.broadcast %277 : vector<1x256xf32> to vector<4x256xf32>
    %280 = arith.mulf %278, %279 : vector<4x256xf32>
    %281 = arith.addf %275, %280 : vector<4x256xf32>
    %282 = vector.broadcast %16 : vector<4x1xf32> to vector<4x256xf32>
    %283 = arith.addf %281, %282 : vector<4x256xf32>
    %284 = vector.broadcast %17 : vector<4x1xf32> to vector<4x256xf32>
    %285 = arith.mulf %283, %284 : vector<4x256xf32>
    %286 = arith.addf %210, %285 : vector<4x256xf32>
    %c0_45 = arith.constant 0 : index
    %c0_46 = arith.constant 0 : index
    %287 = vector.load %arg3[%c0_45, %c0_46] : memref<4x256xf32, #tpu.memory_space<vmem>>, vector<4x256xf32>
    tpu.vector_store %arg3[%c0_45, %c0_46], %286 {strides = array<i32>} : memref<4x256xf32, #tpu.memory_space<vmem>>, vector<4x256xf32>,
    return
  }
  func.func @transform_0(%arg0: i32) -> (i32, i32) {
    %c0_i32 = arith.constant 0 : i32
    %c0_i32_0 = arith.constant 0 : i32
    return %c0_i32, %arg0 : i32, i32
  }
  func.func @transform_1(%arg0: i32) -> (i32, i32) {
    %c0_i32 = arith.constant 0 : i32
    %c0_i32_0 = arith.constant 0 : i32
    %c0_i32_1 = arith.constant 0 : i32
    return %c0_i32, %c0_i32_0 : i32, i32
  }
  func.func @transform_2(%arg0: i32) -> (i32, i32) {
    %c0_i32 = arith.constant 0 : i32
    %c0_i32_0 = arith.constant 0 : i32
    return %c0_i32, %arg0 : i32, i32
  }
}

</mosaic_0001>

<bundles_post_ra>
// kernel: tpu_custom_call.1
= control target key start
LH: loop header
LB: loop body
LE: loop exit
PB: predicated region body
PF: predicated region fallthrough
CT: control target
= control target key end

     0   :  { %7 = vsyncpa [#allocation3], 0  ;;  %s1614_s0 = inlined_call_operand.vmem [shape: f32[4,512], index: 0, kind: input, shape index: {}]   ;;  %s1615_s1 = inlined_call_operand.vmem [shape: f32[144,9], index: 1, kind: input, shape index: {}]   ;;  %s1616_s2 = inlined_call_operand.hbm [shape: f32[4,512], index: 2, kind: output, shape index: {}]  }
   0x1   :  { %9 = vsyncpa [#allocation3 + $0x1], 0  ;;  %s1244_s9 = smov 0   ;;  %s1246_s10 = smov 0  }
   0x2   :  { %s1248_s11 = smov 0   ;;  %s1250_s12 = smov 0  }
   0x3 LB: > { %s1265_s13 = sadd.s32 4294967295, %s1205_s12   ;;  %s1031_s14 = sadd.s32 4294967294, %s1205_s12   ;;  %s1205_s12 = sphi %s1250_s12, %s1622_s12   ;;  %s1201_s11 = sphi %s1248_s11, %s1621_s11   ;;  %s1197_s10 = sphi %s1246_s10, %s1620_s10   ;;  %s1193_s9 = sphi %s1244_s9, %s1619_s9  }
   0x4   : > { %s1269_s15 = sadd.s32 1, %s1205_s12   ;;  %s69_s16 = sadd.s32 1, %s1201_s11 }
   0x5   : > { %s66_s17 = ssub.s32 %s1205_s12, %s1269_s15  ;;  %p79_p0 = scmp.ne.s32.totalorder %s1201_s11, %s1197_s10 }
   0x6   : > { %p67_p1 = scmp.eq.s32.totalorder %s66_s17, 0  ;;  %p80_p2 = scmp.eq.s32.totalorder %s1265_s13, 1 }
   0x7   : > { %p85_p3 = scmp.ne.s32.totalorder %s1197_s10, %s1193_s9  ;;  %p86_p4 = scmp.eq.s32.totalorder %s1031_s14, 1 }
   0x8   : > { %s1280_s18 = scalar_select %p67_p1, %s1201_s11, %s69_s16  }
   0x9   : > { %p1282_p5 = por %p80_p2, %p79_p0  ;;  %p1286_p6 = por %p86_p4, %p85_p3 }
   0xa   : > { %p1034_p7 = scmp.ge.s32.totalorder %s1205_s12, 1  ;;  %p116_p8 = scmp.lt.s32.totalorder %s1205_s12, 3 }
   0xc   : > { %p117_p9 = pnand %p1034_p7, %p116_p8 }
   0xd   : > { %s1036_s25 = sshll.u32 (!%p117_p9), %s1265_s13, 1  ;;  %s1217_s8 = smov (!%p117_p9), 17  }
   0xe   : > { %120 = sbr.rel (%p117_p9) target bundleno = 867 (0x363), region = 28  ;;  %p139_p10 = scmp.lt.s32.totalorder (!%p117_p9), %s1036_s25, 3 }
   0xf   : > { %s1218_s14 = smov (!%p117_p9), 16   ;;  %s1219_s16 = smov (!%p117_p9), 15  }
  0x10   : > { %s1220_s17 = smov (!%p117_p9), 127   ;;  %s1221_s21 = smov (!%p117_p9), 1  }
  0x11   : > { %s1222_s22 = smov (!%p117_p9), 113   ;;  %s1224_s26 = smov (!%p117_p9), 111  }
  0x12   : > { %s1226_s3 = smov (!%p117_p9), 126   ;;  %s1227_s4 = smov (!%p117_p9), 125  }
  0x13   : > { %v145_v0 = vld [vmem:[%s1615_s1] sm:$0xf]  ;;  %v147_v1 = vld [vmem:[%s1615_s1 + $0x10] sm:$0xff]  ;;  %v1207_v2 = vmov 0   ;;  %v146_v3 = vld [vmem:[%s1615_s1 + $0x8] sm:$0xf]  ;;  %v164_v54 = vlaneseq }
  0x14   : > { %1104 = vset.pattern.permute.xlu0 %v1207_v2  ;;  %1105 = vset.pattern.permute.xlu1 %v1207_v2  ;;  %v1208_v4 = vmov 1   ;;  %s1624_s25 = smov (!%p139_p10, %s1036_s25), 3  ;;  %v1209_v5 = vmov 2   ;;  %v1210_v6 = vmov 3   ;;  %v1310_v7 = vld [vmem:[%s1615_s1 + $0x20] sm:$0xff]  ;;  %v148_v8 = vld [vmem:[%s1615_s1 + $0x18] sm:$0xff] }
  0x15   : > { %243 = vperm.xlu0 %1104, %v145_v0   ;;  %269 = vperm.xlu1 %1105, %v147_v1   ;;  %s1037_s28 = sshll.u32 %s1624_s25, 2  ;;  %vm190_vm0 = vcmask 1043456   ;;  %v1211_v13 = vmov 4   ;;  %v1212_v16 = vmov 7   ;;  %v1213_v19 = vmov 5   ;;  %s1223_s25 = smov 112  }
  0x16   : > { %s142_s7 = scalar_lea.vmem %s1614_s0, %s1037_s28  ;;  %v1214_v22 = vmov 6   ;;  %v1215_v29 = vmov 8   ;;  %v1216_v55 = vmov 839922192   ;;  %v1343_v59 = vshrl.u32 %v164_v54, 7  ;;  %s135_s6 = sand.u32 1, %s1197_s10  }
  0x17   : > { %v1321_v9 = vld [vmem:[%s142_s7] sm:$0xff]  ;;  %v246_v56 = vunpack.c.l.s4 %v1216_v55  ;;  %s1035_s7 = sshll.u32 %s135_s6, 3  ;;  %s958_s23 = scalar_lea.sflag [#allocation3], %s135_s6 }
  0x18   : > { %v188_v10 = vcombine.high %v1321_v9, %v1321_v9  ;;  %v191_v11 = vsel %vm190_vm0, %v1321_v9, 0.0 }
  0x19   : > { %256 = vperm.xlu0 %1104, %v146_v3   ;;  %1106 = vset.pattern.permute.xlu1 %v1208_v4  ;;  %v192_v14 = vrot.slane %v191_v11, 4  ;;  %v247_v58 = vunpack.c.0.s8 %v246_v56 }
  0x1a   : > { %294 = vperm.xlu1 %1106, %v147_v1   ;;  %v198_v12 = vsel %vm190_vm0, %v188_v10, 0.0  ;;  %v1350_v10 = vsub.s32 0, %v1343_v59 }
  0x1b   : > { %v199_v15 = vrot.slane %v198_v12, 4  ;;  %v193_v17 = vadd.f32 %v192_v14, %v191_v11  ;;  %v1346_v61 = vsub.s32 %v247_v58, %v1343_v59  ;;  %v279_v11 = vsub.s32 4, %v1343_v59  ;;  %v150_v58 = vld [vmem:[%s1615_s1 + $0x28] sm:$0xff] }
  0x1c   : > { %v1355_v14 = vsub.s32 1, %v1343_v59 }
  0x1d   : > { %1107 = vset.pattern.permute.xlu0 %v1209_v5  ;;  %v200_v18 = vadd.f32 %v199_v15, %v198_v12  ;;  %v194_v20 = vrot.slane %v193_v17, 2  ;;  %v303_v15 = vsub.s32 5, %v1343_v59 }
  0x1e   : > { %320 = vperm.xlu0 %1107, %v147_v1   ;;  %1108 = vset.pattern.permute.xlu1 %v1210_v6 }
  0x1f   : > { %346 = vperm.xlu1 %1108, %v147_v1   ;;  %v201_v21 = vrot.slane %v200_v18, 2  ;;  %v195_v23 = vadd.f32 %v194_v20, %v193_v17  ;;  %v355_v17 = vsub.s32 7, %v1343_v59 }
  0x21   : > { %v202_v24 = vadd.f32 %v201_v21, %v200_v18  ;;  %v196_v25 = vrot.slane %v195_v23, 1  ;;  %v1363_v18 = vsub.s32 2, %v1343_v59 }
  0x22   : > { %1110 = vset.pattern.permute.xlu0 %v1207_v2 }
  0x23   : > { %391 = vperm.xlu0 %1110, %v1310_v7   ;;  %1109 = vset.pattern.permute.xlu1 %v1207_v2  ;;  %v203_v26 = vrot.slane %v202_v24, 1  ;;  %v197_v27 = vadd.f32 %v196_v25, %v195_v23 }
  0x24   : > { %373 = vperm.xlu1 %1109, %v148_v8  }
  0x25   : > { %v204_v28 = vadd.f32 %v203_v26, %v202_v24  ;;  %v205_v30 = vmul.f32 0.25, %v197_v27 }
  0x27   : > { %1113 = vset.pattern.permute.xlu0 %v1210_v6  ;;  %v206_v31 = vmul.f32 0.25, %v204_v28 }
  0x28   : > { %442 = vperm.xlu0 %1113, %v1310_v7   ;;  %1111 = vset.pattern.permute.xlu1 %v1208_v4 }
  0x29   : > { %406 = vperm.xlu1 %1111, %v1310_v7   ;;  %v209_v32 = vcombine.low %v205_v30, %v206_v31 }
  0x2b   : > { %v211_v33 = vsub.f32 %v1321_v9, %v209_v32 }
  0x2c   : > { %1114 = vset.pattern.permute.xlu0 %v1211_v13 }
  0x2d   : > { %450 = vperm.xlu0 %1114, %v1310_v7   ;;  %1112 = vset.pattern.permute.xlu1 %v1209_v5  ;;  %v212_v34 = vmul.f32 %v211_v33, %v211_v33 }
  0x2e   : > { %425 = vperm.xlu1 %1112, %v1310_v7  }
  0x2f   : > { %v214_v35 = vcombine.high %v212_v34, %v212_v34  ;;  %v216_v36 = vsel %vm190_vm0, %v212_v34, 0.0 }
  0x30   : > { %v217_v38 = vrot.slane %v216_v36, 4 }
  0x31   : > { %1117 = vset.pattern.permute.xlu0 %v1212_v16  ;;  %v223_v37 = vsel %vm190_vm0, %v214_v35, 0.0  ;;  %v1359_v16 = vsub.s32 3, %v1343_v59 }
  0x32   : > { %1115 = vset.pattern.permute.xlu1 %v1213_v19  ;;  %503 = vperm.xlu0 %1117, %v1310_v7   ;;  %v224_v39 = vrot.slane %v223_v37, 4  ;;  %v218_v40 = vadd.f32 %v217_v38, %v216_v36  ;;  %v329_v19 = vsub.s32 6, %v1343_v59 }
  0x33   : > { %467 = vperm.xlu1 %1115, %v1310_v7  }
  0x34   : > { %v225_v41 = vadd.f32 %v224_v39, %v223_v37  ;;  %v219_v42 = vrot.slane %v218_v40, 2 }
  0x36   : > { %1118 = vset.pattern.permute.xlu0 %v1215_v29  ;;  %v226_v43 = vrot.slane %v225_v41, 2  ;;  %v220_v44 = vadd.f32 %v219_v42, %v218_v40 }
  0x37   : > { %1116 = vset.pattern.permute.xlu1 %v1214_v22 }
  0x38   : > { %486 = vperm.xlu1 %1116, %v1310_v7   ;;  %v227_v45 = vadd.f32 %v226_v43, %v225_v41  ;;  %v221_v46 = vrot.slane %v220_v44, 1 }
  0x3a   : > { %v228_v47 = vrot.slane %v227_v45, 1  ;;  %v222_v48 = vadd.f32 %v221_v46, %v220_v44 }
  0x3c   : > { %1123 = vset.pattern.permute.xlu1 %v1210_v6  ;;  %v229_v49 = vadd.f32 %v228_v47, %v227_v45  ;;  %v230_v50 = vmul.f32 0.25, %v222_v48 }
  0x3e   : > { %v231_v51 = vmul.f32 0.25, %v229_v49  ;;  %v232_v52 = vadd.f32 1e-06, %v230_v50 }
  0x40   : > { %v233_v53 = vadd.f32 1e-06, %v231_v51  ;;  %1137 = vrsqrt.f32 %v232_v52 }
  0x42   : > { %1139 = vrsqrt.f32 %v233_v53 }
  0x4d   : > { %v1138_v57 = vpop.eup %1137 }
  0x4f   : > { %v1140_v60 = vpop.eup %1139 }
  0x50   : > { %v238_v62 = vcombine.low %v1138_v57, %v1140_v60 }
  0x52   : > { %v240_v0 = vmul.f32 %v238_v62, %v211_v33 }
  0x90   : > { %v244_v63 = vpop.permute.xlu0 %243  ;;  %v270_v3 = vpop.permute.xlu1 %269 }
  0x91   : > { %v251_v1 = vrot.slane %v244_v63, %v1346_v61 }
  0x93   : > { %v253_v12 = vmul.f32 %v251_v1, %v240_v0 }
  0x94   : > { %v257_v8 = vpop.permute.xlu0 %256 }
  0x95   : > { %v264_v13 = vrot.slane %v257_v8, %v1346_v61  ;;  %v295_v21 = vpop.permute.xlu1 %294 }
  0x97   : > { %v266_v20 = vadd.f32 %v264_v13, %v253_v12 }
  0x99   : > { %v276_v22 = vrot.slane %v266_v20, %v1350_v10  ;;  %v280_v23 = vrot.slane %v266_v20, %v279_v11  ;;  %v300_v24 = vrot.slane %v266_v20, %v1355_v14  ;;  %v304_v25 = vrot.slane %v266_v20, %v303_v15  ;;  %v321_v36 = vpop.permute.xlu0 %320 }
  0x9a   : > { %v352_v26 = vrot.slane %v266_v20, %v1359_v16  ;;  %v356_v27 = vrot.slane %v266_v20, %v355_v17  ;;  %v326_v28 = vrot.slane %v266_v20, %v1363_v18  ;;  %v330_v29 = vrot.slane %v266_v20, %v329_v19  ;;  %v347_v43 = vpop.permute.xlu1 %346 }
  0x9b   : > { %v286_v30 = vrot.slane %v276_v22, %v1350_v10  ;;  %v290_v31 = vrot.slane %v280_v23, %v1350_v10  ;;  %v310_v32 = vrot.slane %v300_v24, %v1355_v14  ;;  %v314_v33 = vrot.slane %v304_v25, %v1355_v14 }
  0x9c   : > { %v362_v34 = vrot.slane %v352_v26, %v1359_v16  ;;  %v366_v35 = vrot.slane %v356_v27, %v1359_v16  ;;  %v336_v37 = vrot.slane %v326_v28, %v1363_v18  ;;  %v340_v38 = vrot.slane %v330_v29, %v1363_v18 }
  0x9d   : > { %v291_v39 = vmul.f32 %v286_v30, %v270_v3  ;;  %v292_v40 = vmul.f32 %v290_v31, %v270_v3  ;;  %v315_v41 = vmul.f32 %v310_v32, %v295_v21  ;;  %v316_v42 = vmul.f32 %v314_v33, %v295_v21 }
  0x9e   : > { %v341_v46 = vmul.f32 %v336_v37, %v321_v36  ;;  %v342_v47 = vmul.f32 %v340_v38, %v321_v36  ;;  %v367_v48 = vmul.f32 %v362_v34, %v347_v43  ;;  %v368_v49 = vmul.f32 %v366_v35, %v347_v43  ;;  %v392_v60 = vpop.permute.xlu0 %391 }
  0x9f   : > { %v317_v44 = vadd.f32 %v315_v41, %v291_v39  ;;  %v318_v45 = vadd.f32 %v316_v42, %v292_v40  ;;  %v374_v52 = vpop.permute.xlu1 %373  ;;  %v1419_v3 = vand.u32 127, %v164_v54  ;;  %v1225_v26 = vmov 0.0  }
  0xa1   : > { %v343_v50 = vadd.f32 %v341_v46, %v317_v44  ;;  %v344_v51 = vadd.f32 %v342_v47, %v318_v45  ;;  %v166_v13 = vadd.s32 128, %v1419_v3  ;;  %v167_v20 = vand.u32 15, %v1419_v3 }
  0xa2   : > { %v169_v21 = vand.u32 255, %v1419_v3  ;;  %vm400_vm5 = vcmp.lt.s32.totalorder %v1419_v3, 16  ;;  %vm382_vm7 = vcmp.lt.s32.totalorder %v1419_v3, 17  ;;  %vm417_vm8 = vcmp.lt.s32.totalorder %v1419_v3, 15 }
  0xa3   : > { %v369_v53 = vadd.f32 %v367_v48, %v343_v50  ;;  %v370_v55 = vadd.f32 %v368_v49, %v344_v51  ;;  %v1414_v63 = vpop.permute.xlu0 %442  ;;  %v168_v23 = vand.u32 15, %v166_v13  ;;  %vm171_vm1 = vcmp.ge.s32.totalorder %v167_v20, 1 }
  0xa4   : > { %vm179_vm2 = vcmp.ge.s32.totalorder %v169_v21, 16  ;;  %vm175_vm3 = vcmp.lt.s32.totalorder %v167_v20, 15  ;;  %v1429_v27 = vsel %vm171_vm1, 1.0, %v1225_v26  ;;  %v170_v42 = vand.u32 255, %v166_v13 }
  0xa5   : > { %v1386_v56 = vadd.f32 %v374_v52, %v369_v53  ;;  %v1388_v57 = vadd.f32 %v374_v52, %v370_v55  ;;  %vm172_vm4 = vcmp.ge.s32.totalorder %v168_v23, 1  ;;  %v181_v28 = vsel %vm179_vm2, 1.0, %v1225_v26 }
  0xa6   : > { %vm176_vm6 = vcmp.lt.s32.totalorder %v168_v23, 15  ;;  %v1431_v29 = vsel %vm175_vm3, 1.0, %v1225_v26  ;;  %v174_v31 = vsel %vm172_vm4, 1.0, %v1225_v26  ;;  %v385_v32 = vmul.f32 %v181_v28, %v1429_v27 }
  0xa7   : > { %380 = vrot.lane.b32.xlu0 %v1388_v57, %s1217_s8  ;;  %378 = vrot.lane.b32.xlu1 %v1386_v56, %s1217_s8  ;;  %v1438_v34 = vsel %vm176_vm6, 1.0, %v1225_v26  ;;  %v420_v35 = vmul.f32 %v181_v28, %v1431_v29  ;;  %vm436_vm9 = vcmp.lt.s32.totalorder %v1419_v3, 1  ;;  %vm184_vm10 = vcmp.lt.s32.totalorder %v170_v42, 240  ;;  %s1043_s8 = sshll.u32 %s1265_s13, 7 }
  0xa8   : > { %v451_v1 = vpop.permute.xlu0 %450  ;;  %vm461_vm11 = vcmp.lt.s32.totalorder %v1419_v3, 127  ;;  %v186_v21 = vsel %vm184_vm10, 1.0, %v1225_v26  ;;  %vm478_vm12 = vcmp.lt.s32.totalorder %v1419_v3, 113  ;;  %vm497_vm13 = vcmp.lt.s32.totalorder %v1419_v3, 112 }
  0xa9   : > { %v482_v26 = vmul.f32 %v186_v21, %v174_v31  ;;  %vm514_vm14 = vcmp.lt.s32.totalorder %v1419_v3, 111 }
  0xab   : > { %398 = vrot.lane.b32.xlu0 %v1388_v57, %s1218_s14  ;;  %396 = vrot.lane.b32.xlu1 %v1386_v56, %s1218_s14  ;;  %s137_s14 = scalar_lea.vmem [#allocation2], %s1035_s7 }
  0xad   : > { %v1423_v12 = vpop.permute.xlu0 %503 }
  0xaf   : > { %413 = vrot.lane.b32.xlu0 %v1386_v56, %s1219_s16  ;;  %415 = vrot.lane.b32.xlu1 %v1388_v57, %s1219_s16  ;;  %s972_s16 = sshll.u32 %s137_s14, 4  ;;  %s973_s16 = int_to_ptr.vmem [resolvable:$true] %s972_s16 }
  0xb0   : > { %s1145_s24 = scalar_lea.vmem %s973_s16, 128 }
  0xb1   : > { %p1146_p11 = scmp.ne.s32.totalorder %s973_s16, %s1145_s24 }
  0xb3   : > { %459 = vrot.lane.b32.xlu0 %v1388_v57, %s1220_s17  ;;  %432 = vrot.lane.b32.xlu1 %v1386_v56, %s1221_s21  ;;  %p1147_p12 = pnand %p1146_p11, %p1282_p5 }
  0xb5   : > { %p1148_p13 = pneg %p1147_p12 }
  0xb7   : > { %474 = vrot.lane.b32.xlu0 %v1386_v56, %s1222_s22  ;;  %434 = vrot.lane.b32.xlu1 %v1388_v57, %s1221_s21 }
  0xbb   : > { %457 = vrot.lane.b32.xlu1 %v1386_v56, %s1220_s17  ;;  %522 = vperm.xlu0 %1118, %v1310_v7   ;;  %v407_v7 = vpop.permute.xlu1 %406 }
  0xbf   : > { %476 = vrot.lane.b32.xlu1 %v1388_v57, %s1222_s22  ;;  %1119 = vset.pattern.permute.xlu0 %v1207_v2  ;;  %v426_v62 = vpop.permute.xlu1 %425  ;;  %s970_s22 = scalar_lea.hbm %s1616_s2, %s1043_s8 }
  0xc0   : > { %531 = vperm.xlu0 %1119, %v150_v58  }
  0xc3   : > { %493 = vrot.lane.b32.xlu1 %v1386_v56, %s1223_s25  ;;  %v1416_v0 = vpop.permute.xlu1 %467 }
  0xc4   : > { %1120 = vset.pattern.permute.xlu0 %v1208_v4 }
  0xc7   : > { %495 = vrot.lane.b32.xlu1 %v1388_v57, %s1223_s25  ;;  %v1421_v8 = vpop.permute.xlu1 %486  ;;  %s1228_s25 = smov [#allocation2]  }
  0xcb   : > { %510 = vrot.lane.b32.xlu1 %v1386_v56, %s1224_s26 }
  0xcf   : > { %512 = vrot.lane.b32.xlu1 %v1388_v57, %s1224_s26  ;;  %s1149_s26 = sshll.u32 %s1228_s25, 4  ;;  %s1150_s26 = int_to_ptr.vmem [resolvable:$false] %s1149_s26 }
  0xd0   : > { %s1151_s13 = scalar_lea.vmem %s1150_s26, 256  ;;  %p1152_p0 = scmp.lt.s32.totalorder %s973_s16, %s1150_s26 }
  0xd1   : > { %p1153_p1 = scmp.lt.s32.totalorder %s1151_s13, %s1145_s24 }
  0xd3   : > { %p1154_p2 = por %p1153_p1, %p1152_p0 }
  0xd5   : > { %p1155_p3 = pnand %p1154_p2, %p1148_p13 }
 0x119   : > { %v381_v22 = vpop.permute.xlu0 %380  ;;  %v379_v24 = vpop.permute.xlu1 %378 }
 0x11a   : > { %v383_v37 = vsel %vm382_vm7, %v379_v24, %v381_v22  ;;  %v384_v38 = vsel %vm382_vm7, %v381_v22, %v379_v24 }
 0x11b   : > { %v387_v44 = vmul.f32 %v385_v32, %v384_v38  ;;  %v388_v45 = vmul.f32 %v383_v37, %v174_v31 }
 0x11d   : > { %v399_v25 = vpop.permute.xlu0 %398  ;;  %v397_v54 = vpop.permute.xlu1 %396  ;;  %v394_v51 = vmul.f32 %v392_v60, %v387_v44  ;;  %v395_v52 = vmul.f32 %v392_v60, %v388_v45 }
 0x11e   : > { %v402_v30 = vsel %vm400_vm5, %v399_v25, %v397_v54  ;;  %v401_v43 = vsel %vm400_vm5, %v397_v54, %v399_v25 }
 0x11f   : > { %v403_v41 = vmul.f32 %v402_v30, %v181_v28  ;;  %v410_v50 = vmul.f32 %v407_v7, %v401_v43  ;;  %v454_v28 = vmul.f32 %v451_v1, %v1388_v57 }
 0x121   : > { %v414_v33 = vpop.permute.xlu0 %413  ;;  %v416_v36 = vpop.permute.xlu1 %415  ;;  %v409_v49 = vmul.f32 %v407_v7, %v403_v41  ;;  %v412_v23 = vadd.f32 %v410_v50, %v395_v52  ;;  %v453_v7 = vmul.f32 %v451_v1, %v1386_v56 }
 0x122   : > { %v418_v39 = vsel %vm417_vm8, %v414_v33, %v416_v36  ;;  %v419_v40 = vsel %vm417_vm8, %v416_v36, %v414_v33 }
 0x123   : > { %v422_v46 = vmul.f32 %v420_v35, %v419_v40  ;;  %v423_v47 = vmul.f32 %v418_v39, %v1438_v34  ;;  %v411_v22 = vadd.f32 %v409_v49, %v394_v51 }
 0x125   : > { %v433_v48 = vpop.permute.xlu1 %432  ;;  %v428_v53 = vmul.f32 %v426_v62, %v422_v46  ;;  %v429_v55 = vmul.f32 %v426_v62, %v423_v47  ;;  %v460_v24 = vpop.permute.xlu0 %459 }
 0x127   : > { %v430_v30 = vadd.f32 %v428_v53, %v411_v22  ;;  %v431_v60 = vadd.f32 %v429_v55, %v412_v23  ;;  %v518_v23 = vmul.f32 %v186_v21, %v1438_v34 }
 0x129   : > { %v435_v58 = vpop.permute.xlu1 %434  ;;  %v475_v40 = vpop.permute.xlu0 %474 }
 0x12a   : > { %v437_v13 = vsel %vm436_vm9, %v433_v48, %v435_v58  ;;  %v438_v20 = vsel %vm436_vm9, %v435_v58, %v433_v48 }
 0x12b   : > { %v439_v25 = vmul.f32 %v438_v20, %v1429_v27  ;;  %v440_v54 = vmul.f32 %v437_v13, %v174_v31 }
 0x12d   : > { %v445_v62 = vmul.f32 %v1414_v63, %v439_v25  ;;  %v446_v32 = vmul.f32 %v1414_v63, %v440_v54  ;;  %v458_v33 = vpop.permute.xlu1 %457 }
 0x12e   : > { %v462_v35 = vsel %vm461_vm11, %v458_v33, %v460_v24  ;;  %v463_v36 = vsel %vm461_vm11, %v460_v24, %v458_v33 }
 0x12f   : > { %v447_v37 = vadd.f32 %v445_v62, %v430_v30  ;;  %v448_v38 = vadd.f32 %v446_v32, %v431_v60  ;;  %v464_v39 = vmul.f32 %v462_v35, %v1431_v29  ;;  %v465_v56 = vmul.f32 %v463_v36, %v1438_v34 }
 0x131   : > { %v456_v57 = vadd.f32 %v454_v28, %v448_v38  ;;  %v455_v1 = vadd.f32 %v453_v7, %v447_v37  ;;  %v470_v41 = vmul.f32 %v1416_v0, %v464_v39  ;;  %v471_v42 = vmul.f32 %v1416_v0, %v465_v56  ;;  %v477_v63 = vpop.permute.xlu1 %476  ;;  %v153_v39 = vld [vmem:[%s1615_s1 + $0x40] sm:$0xf] }
 0x132   : > { %v479_v43 = vsel %vm478_vm12, %v475_v40, %v477_v63  ;;  %v480_v44 = vsel %vm478_vm12, %v477_v63, %v475_v40 }
 0x133   : > { %v472_v45 = vadd.f32 %v470_v41, %v455_v1  ;;  %v473_v46 = vadd.f32 %v471_v42, %v456_v57  ;;  %v483_v31 = vmul.f32 %v479_v43, %v1429_v27  ;;  %v484_v47 = vmul.f32 %v482_v26, %v480_v44  ;;  %v151_v57 = vld [vmem:[%s1615_s1 + $0x30] sm:$0xf] }
 0x135   : > { %v489_v48 = vmul.f32 %v1421_v8, %v483_v31  ;;  %v490_v49 = vmul.f32 %v1421_v8, %v484_v47  ;;  %v494_v50 = vpop.permute.xlu1 %493  ;;  %v156_v31 = vld [vmem:[%s1615_s1 + $0x58] sm:$0xf]  ;;  %v158_v47 = vld [vmem:[%s1615_s1 + $0x68] sm:$0xff] }
 0x136   : > { %v523_v24 = vpop.permute.xlu0 %522 }
 0x137   : > { %v492_v51 = vadd.f32 %v490_v49, %v473_v46  ;;  %v491_v52 = vadd.f32 %v489_v48, %v472_v45  ;;  %v160_v48 = vld [vmem:[%s1615_s1 + $0x78] sm:$0xf]  ;;  %v161_v49 = vld [vmem:[%s1615_s1 + $0x80] sm:$0xf] }
 0x139   : > { %v496_v53 = vpop.permute.xlu1 %495 }
 0x13a   : > { %v498_v55 = vsel %vm497_vm13, %v494_v50, %v496_v53  ;;  %v499_v0 = vsel %vm497_vm13, %v496_v53, %v494_v50 }
 0x13b   : > { %v501_v58 = vmul.f32 %v499_v0, %v186_v21  ;;  %v506_v13 = vmul.f32 %v1423_v12, %v498_v55  ;;  %v532_v32 = vpop.permute.xlu0 %531  ;;  %v152_v55 = vld [vmem:[%s1615_s1 + $0x38] sm:$0xf] }
 0x13d   : > { %v507_v20 = vmul.f32 %v1423_v12, %v501_v58  ;;  %v508_v22 = vadd.f32 %v506_v13, %v491_v52  ;;  %v511_v27 = vpop.permute.xlu1 %510 }
 0x13f   : > { %v509_v8 = vadd.f32 %v507_v20, %v492_v51  ;;  %v155_v20 = vld [vmem:[%s1615_s1 + $0x50] sm:$0xf] }
 0x141   : > { %v513_v25 = vpop.permute.xlu1 %512 }
 0x142   : > { %v515_v54 = vsel %vm514_vm14, %v511_v27, %v513_v25  ;;  %v516_v7 = vsel %vm514_vm14, %v513_v25, %v511_v27  ;;  %v159_v27 = vld [vmem:[%s1615_s1 + $0x70] sm:$0xff] }
 0x143   : > { %v519_v28 = vmul.f32 %v515_v54, %v1431_v29  ;;  %v520_v30 = vmul.f32 %v518_v23, %v516_v7  ;;  %v162_v23 = vld [vmem:[%s1615_s1 + $0x88] sm:$0xf] }
 0x145   : > { %v525_v60 = vmul.f32 %v523_v24, %v519_v28  ;;  %v526_v62 = vmul.f32 %v523_v24, %v520_v30 }
 0x147   : > { %v527_v33 = vadd.f32 %v525_v60, %v508_v22  ;;  %v528_v35 = vadd.f32 %v526_v62, %v509_v8  ;;  %v157_v22 = vld [vmem:[%s1615_s1 + $0x60] sm:$0xf] }
 0x149   : > { %v534_v12 = vadd.f32 %v532_v32, %v527_v33  ;;  %v535_v36 = vadd.f32 %v532_v32, %v528_v35 }
 0x14b   : > { %v538_v26 = vrot.slane %v534_v12, 4  ;;  %v539_v37 = vrot.slane %v535_v36, 4 }
 0x14d   : > { %v1465_v3 = vmul.f32 %v538_v26, %v534_v12  ;;  %v1467_v34 = vmul.f32 %v539_v37, %v535_v36 }
 0x14f   : > { %v544_v21 = vsel %vm190_vm0, %v1465_v3, 0.0  ;;  %v545_v29 = vsel %vm190_vm0, %v1467_v34, 0.0 }
 0x150   : > { %v546_v38 = vadd.f32 %v545_v29, %v544_v21 }
 0x152   : > { %547 = vadd.xlane.f32.xlu1 %v546_v38 }
 0x163   : > { %642 = vperm.xlu1 %1123, %v153_v39  }
 0x167   : > { %1125 = vset.pattern.permute.xlu1 %v1207_v2 }
 0x168   : > { %731 = vperm.xlu1 %1125, %v156_v31  }
 0x16c   : > { %757 = vperm.xlu1 %1125, %v158_v47  }
 0x170   : > { %1127 = vset.pattern.permute.xlu1 %v1209_v5 }
 0x171   : > { %808 = vperm.xlu1 %1127, %v158_v47  }
 0x175   : > { %1128 = vset.pattern.permute.xlu1 %v1210_v6 }
 0x176   : > { %834 = vperm.xlu1 %1128, %v158_v47  }
 0x17a   : > { %1130 = vset.pattern.permute.xlu1 %v1207_v2 }
 0x17b   : > { %876 = vperm.xlu1 %1130, %v160_v48  }
 0x17f   : > { %1131 = vset.pattern.permute.xlu1 %v1208_v4 }
 0x180   : > { %890 = vperm.xlu1 %1131, %v160_v48  }
 0x184   : > { %1133 = vset.pattern.permute.xlu1 %v1210_v6  ;;  %v154_v6 = vld [vmem:[%s1615_s1 + $0x48] sm:$0xf] }
 0x185   : > { %922 = vperm.xlu1 %1133, %v160_v48  }
 0x189   : > { %1134 = vset.pattern.permute.xlu1 %v1207_v2 }
 0x18a   : > { %939 = vperm.xlu1 %1134, %v161_v49  }
 0x1db   : > { %v548_v56 = vpop.xlane.xlu1 %547 }
 0x1dc   : > { %v550_v40 = vmul.f32 0.00390625, %v548_v56 }
 0x1de   : > { %v559_v1 = vrot.slane %v550_v40, %v1355_v14  ;;  %v554_v41 = vrot.slane %v550_v40, %v1350_v10  ;;  %v569_v63 = vrot.slane %v550_v40, %v1363_v18  ;;  %v579_v45 = vrot.slane %v550_v40, %v1359_v16 }
 0x1e0   : > { %v560_v42 = vmul.f32 %v559_v1, %v151_v57  ;;  %v555_v43 = vmul.f32 %v554_v41, %v151_v57  ;;  %v570_v44 = vmul.f32 %v569_v63, %v151_v57  ;;  %v580_v46 = vmul.f32 %v579_v45, %v151_v57 }
 0x1e2   : > { %562 = vrot.lane.b32.xlu0 %v560_v42, %s1220_s17 }
 0x1e6   : > { %572 = vrot.lane.b32.xlu0 %v570_v44, %s1226_s3 }
 0x1ea   : > { %582 = vrot.lane.b32.xlu0 %v580_v46, %s1227_s4 }
 0x1ee   : > { %610 = vperm.xlu0 %1120, %v153_v39  }
 0x1f2   : > { %1121 = vset.pattern.permute.xlu0 %v1207_v2 }
 0x1f3   : > { %596 = vperm.xlu0 %1121, %v153_v39  }
 0x254   : > { %v563_v50 = vpop.permute.xlu0 %562 }
 0x255   : > { %v565_v52 = vadd.f32 %v563_v50, %v555_v43 }
 0x258   : > { %v573_v51 = vpop.permute.xlu0 %572 }
 0x259   : > { %v575_v53 = vadd.f32 %v573_v51, %v565_v52 }
 0x25c   : > { %v583_v0 = vpop.permute.xlu0 %582 }
 0x25d   : > { %v585_v58 = vadd.f32 %v583_v0, %v575_v53 }
 0x25f   : > { %v586_v13 = vadd.f32 %v585_v58, %v152_v55 }
 0x261   : > { %589 = vperm.xlu0 %1121, %v586_v13  }
 0x265   : > { %1122 = vset.pattern.permute.xlu0 %v1209_v5 }
 0x266   : > { %626 = vperm.xlu0 %1122, %v153_v39  }
 0x269   : > { %v611_v8 = vpop.permute.xlu0 %610 }
 0x26a   : > { %1124 = vset.pattern.permute.xlu0 %v1207_v2 }
 0x26b   : > { %659 = vperm.xlu0 %1124, %v154_v6  }
 0x26f   : > { %666 = vperm.xlu0 %1124, %v155_v20  }
 0x273   : > { %744 = vperm.xlu0 %1124, %v157_v22  }
 0x277   : > { %1126 = vset.pattern.permute.xlu0 %v1208_v4  ;;  %v597_v4 = vpop.permute.xlu0 %596 }
 0x278   : > { %782 = vperm.xlu0 %1126, %v158_v47  }
 0x27c   : > { %1129 = vset.pattern.permute.xlu0 %v1207_v2 }
 0x27d   : > { %861 = vperm.xlu0 %1129, %v159_v27  }
 0x281   : > { %1132 = vset.pattern.permute.xlu0 %v1209_v5 }
 0x282   : > { %906 = vperm.xlu0 %1132, %v160_v48  }
 0x286   : > { %1135 = vset.pattern.permute.xlu0 %v1207_v2 }
 0x287   : > { %946 = vperm.xlu0 %1135, %v162_v23  }
 0x2dc   : > { %v590_v24 = vpop.permute.xlu0 %589 }
 0x2dd   : > { %v592_v25 = vmul.f32 %v590_v24, %v1465_v3  ;;  %v593_v54 = vmul.f32 %v590_v24, %v1467_v34  ;;  %v643_v34 = vpop.permute.xlu1 %642 }
 0x2df   : > { %v602_v7 = vrot.slane %v592_v25, %v1350_v10  ;;  %v606_v28 = vrot.slane %v593_v54, %v1350_v10  ;;  %v616_v5 = vrot.slane %v592_v25, %v1355_v14  ;;  %v620_v30 = vrot.slane %v593_v54, %v1355_v14 }
 0x2e0   : > { %v632_v60 = vrot.slane %v592_v25, %v1363_v18  ;;  %v636_v2 = vrot.slane %v593_v54, %v1363_v18  ;;  %v648_v62 = vrot.slane %v592_v25, %v1359_v16  ;;  %v652_v32 = vrot.slane %v593_v54, %v1359_v16 }
 0x2e1   : > { %v607_v33 = vmul.f32 %v602_v7, %v597_v4  ;;  %v608_v35 = vmul.f32 %v606_v28, %v597_v4  ;;  %v627_v12 = vpop.permute.xlu0 %626  ;;  %v621_v36 = vmul.f32 %v616_v5, %v611_v8  ;;  %v622_v26 = vmul.f32 %v620_v30, %v611_v8 }
 0x2e2   : > { %v637_v37 = vmul.f32 %v632_v60, %v627_v12  ;;  %v638_v3 = vmul.f32 %v636_v2, %v627_v12  ;;  %v653_v38 = vmul.f32 %v648_v62, %v643_v34  ;;  %v654_v39 = vmul.f32 %v652_v32, %v643_v34 }
 0x2e3   : > { %v623_v21 = vadd.f32 %v621_v36, %v607_v33  ;;  %v624_v29 = vadd.f32 %v622_v26, %v608_v35 }
 0x2e5   : > { %v639_v56 = vadd.f32 %v637_v37, %v623_v21  ;;  %v640_v40 = vadd.f32 %v638_v3, %v624_v29 }
 0x2e6   : > { %v660_v57 = vpop.permute.xlu0 %659 }
 0x2e7   : > { %v655_v1 = vadd.f32 %v653_v38, %v639_v56  ;;  %v656_v41 = vadd.f32 %v654_v39, %v640_v40  ;;  %v732_v38 = vpop.permute.xlu1 %731 }
 0x2e8   : > { %v739_v40 = vrot.slane %v732_v38, %v1346_v61 }
 0x2e9   : > { %v662_v42 = vadd.f32 %v660_v57, %v655_v1  ;;  %v663_v63 = vadd.f32 %v660_v57, %v656_v41 }
 0x2ea   : > { %v667_v43 = vpop.permute.xlu0 %666 }
 0x2eb   : > { %v669_v44 = vmul.f32 %v667_v43, %v662_v42  ;;  %v670_v45 = vmul.f32 %v667_v43, %v663_v63  ;;  %v758_v63 = vpop.permute.xlu1 %757 }
 0x2ed   : > { %v673_v46 = vcombine.low %v669_v44, %v670_v45 }
 0x2ee   : > { %v745_v57 = vpop.permute.xlu0 %744 }
 0x2ef   : > { %v1539_v31 = vadd.f32 %v673_v46, %v1321_v9  ;;  %v752_v41 = vrot.slane %v745_v57, %v1346_v61 }
 0x2f1   : > { %v677_v47 = vcombine.high %v1539_v31, %v1539_v31  ;;  %v679_v48 = vsel %vm190_vm0, %v1539_v31, 0.0 }
 0x2f2   : > { %v680_v49 = vrot.slane %v679_v48, 4 }
 0x2f3   : > { %v686_v50 = vsel %vm190_vm0, %v677_v47, 0.0 }
 0x2f4   : > { %v681_v51 = vadd.f32 %v680_v49, %v679_v48  ;;  %v687_v52 = vrot.slane %v686_v50, 4  ;;  %v809_v48 = vpop.permute.xlu1 %808 }
 0x2f6   : > { %v682_v53 = vrot.slane %v681_v51, 2  ;;  %v688_v55 = vadd.f32 %v687_v52, %v686_v50 }
 0x2f8   : > { %v683_v0 = vadd.f32 %v682_v53, %v681_v51  ;;  %v689_v58 = vrot.slane %v688_v55, 2  ;;  %v783_v53 = vpop.permute.xlu0 %782 }
 0x2fa   : > { %v684_v13 = vrot.slane %v683_v0, 1  ;;  %v690_v6 = vadd.f32 %v689_v58, %v688_v55 }
 0x2fc   : > { %v685_v20 = vadd.f32 %v684_v13, %v683_v0  ;;  %v691_v9 = vrot.slane %v690_v6, 1 }
 0x2fe   : > { %v692_v22 = vadd.f32 %v691_v9, %v690_v6  ;;  %v693_v27 = vmul.f32 0.25, %v685_v20  ;;  %v835_v9 = vpop.permute.xlu1 %834 }
 0x300   : > { %v694_v23 = vmul.f32 0.25, %v692_v22 }
 0x302   : > { %v697_v8 = vcombine.low %v693_v27, %v694_v23 }
 0x304   : > { %v699_v4 = vsub.f32 %v1539_v31, %v697_v8 }
 0x306   : > { %v700_v24 = vmul.f32 %v699_v4, %v699_v4 }
 0x308   : > { %v702_v25 = vcombine.high %v700_v24, %v700_v24  ;;  %v704_v54 = vsel %vm190_vm0, %v700_v24, 0.0 }
 0x309   : > { %v705_v7 = vrot.slane %v704_v54, 4 }
 0x30a   : > { %v711_v28 = vsel %vm190_vm0, %v702_v25, 0.0 }
 0x30b   : > { %v706_v5 = vadd.f32 %v705_v7, %v704_v54  ;;  %v712_v30 = vrot.slane %v711_v28, 4  ;;  %v862_v7 = vpop.permute.xlu0 %861 }
 0x30d   : > { %v707_v60 = vrot.slane %v706_v5, 2  ;;  %v713_v2 = vadd.f32 %v712_v30, %v711_v28  ;;  %v877_v28 = vpop.permute.xlu1 %876 }
 0x30f   : > { %v708_v62 = vadd.f32 %v707_v60, %v706_v5  ;;  %v714_v32 = vrot.slane %v713_v2, 2 }
 0x311   : > { %v709_v33 = vrot.slane %v708_v62, 1  ;;  %v715_v35 = vadd.f32 %v714_v32, %v713_v2 }
 0x313   : > { %v710_v12 = vadd.f32 %v709_v33, %v708_v62  ;;  %v716_v36 = vrot.slane %v715_v35, 1  ;;  %v891_v33 = vpop.permute.xlu1 %890 }
 0x315   : > { %v717_v26 = vadd.f32 %v716_v36, %v715_v35  ;;  %v718_v37 = vmul.f32 0.25, %v710_v12 }
 0x317   : > { %v719_v3 = vmul.f32 0.25, %v717_v26  ;;  %v720_v34 = vadd.f32 1e-06, %v718_v37 }
 0x319   : > { %v721_v21 = vadd.f32 1e-06, %v719_v3  ;;  %1141 = vrsqrt.f32 %v720_v34  ;;  %v907_v34 = vpop.permute.xlu0 %906 }
 0x31b   : > { %1143 = vrsqrt.f32 %v721_v21 }
 0x326   : > { %v1142_v29 = vpop.eup %1141 }
 0x328   : > { %v1144_v39 = vpop.eup %1143 }
 0x329   : > { %v726_v56 = vcombine.low %v1142_v29, %v1144_v39 }
 0x32b   : > { %v728_v1 = vmul.f32 %v726_v56, %v699_v4 }
 0x32d   : > { %v741_v42 = vmul.f32 %v739_v40, %v728_v1 }
 0x32f   : > { %v754_v43 = vadd.f32 %v752_v41, %v741_v42  ;;  %v923_v41 = vpop.permute.xlu1 %922 }
 0x331   : > { %v764_v44 = vrot.slane %v754_v43, %v1350_v10  ;;  %v768_v45 = vrot.slane %v754_v43, %v279_v11  ;;  %v814_v46 = vrot.slane %v754_v43, %v1363_v18  ;;  %v818_v47 = vrot.slane %v754_v43, %v329_v19 }
 0x332   : > { %v788_v49 = vrot.slane %v754_v43, %v1355_v14  ;;  %v792_v50 = vrot.slane %v754_v43, %v303_v15  ;;  %v840_v61 = vrot.slane %v754_v43, %v1359_v16  ;;  %v844_v51 = vrot.slane %v754_v43, %v355_v17 }
 0x333   : > { %v774_v52 = vrot.slane %v764_v44, %v1350_v10  ;;  %v778_v11 = vrot.slane %v768_v45, %v1350_v10  ;;  %v824_v55 = vrot.slane %v814_v46, %v1363_v18  ;;  %v828_v19 = vrot.slane %v818_v47, %v1363_v18 }
 0x334   : > { %v798_v0 = vrot.slane %v788_v49, %v1355_v14  ;;  %v802_v58 = vrot.slane %v792_v50, %v1355_v14  ;;  %v850_v59 = vrot.slane %v840_v61, %v1359_v16  ;;  %v854_v17 = vrot.slane %v844_v51, %v1359_v16 }
 0x335   : > { %v779_v13 = vmul.f32 %v774_v52, %v758_v63  ;;  %v780_v15 = vmul.f32 %v778_v11, %v758_v63  ;;  %v829_v22 = vmul.f32 %v824_v55, %v809_v48  ;;  %v830_v27 = vmul.f32 %v828_v19, %v809_v48 }
 0x336   : > { %v803_v6 = vmul.f32 %v798_v0, %v783_v53  ;;  %v804_v20 = vmul.f32 %v802_v58, %v783_v53  ;;  %v855_v4 = vmul.f32 %v850_v59, %v835_v9  ;;  %v856_v24 = vmul.f32 %v854_v17, %v835_v9 }
 0x338   : > { %v805_v23 = vadd.f32 %v803_v6, %v779_v13  ;;  %v806_v8 = vadd.f32 %v804_v20, %v780_v15 }
 0x33a   : > { %v831_v25 = vadd.f32 %v829_v22, %v805_v23  ;;  %v832_v54 = vadd.f32 %v830_v27, %v806_v8 }
 0x33c   : > { %v857_v5 = vadd.f32 %v855_v4, %v831_v25  ;;  %v858_v30 = vadd.f32 %v856_v24, %v832_v54 }
 0x33e   : > { %v864_v60 = vadd.f32 %v862_v7, %v857_v5  ;;  %v865_v2 = vadd.f32 %v862_v7, %v858_v30 }
 0x340   : > { %v868_v62 = vrot.slane %v864_v60, 4  ;;  %v869_v32 = vrot.slane %v865_v2, 4 }
 0x342   : > { %v872_v35 = vmul.f32 %v868_v62, %v864_v60  ;;  %v873_v12 = vmul.f32 %v869_v32, %v865_v2 }
 0x344   : > { %v882_v36 = vrot.slane %v872_v35, %v1350_v10  ;;  %v886_v26 = vrot.slane %v873_v12, %v1350_v10  ;;  %v896_v37 = vrot.slane %v872_v35, %v1355_v14  ;;  %v900_v3 = vrot.slane %v873_v12, %v1355_v14 }
 0x345   : > { %v912_v21 = vrot.slane %v872_v35, %v1363_v18  ;;  %v916_v29 = vrot.slane %v873_v12, %v1363_v18  ;;  %v928_v38 = vrot.slane %v872_v35, %v1359_v16  ;;  %v932_v39 = vrot.slane %v873_v12, %v1359_v16  ;;  %v940_v18 = vpop.permute.xlu1 %939  ;;  %v947_v16 = vpop.permute.xlu0 %946 }
 0x346   : > { %v887_v56 = vmul.f32 %v882_v36, %v877_v28  ;;  %v888_v40 = vmul.f32 %v886_v26, %v877_v28  ;;  %v901_v57 = vmul.f32 %v896_v37, %v891_v33  ;;  %v902_v1 = vmul.f32 %v900_v3, %v891_v33 }
 0x347   : > { %v917_v63 = vmul.f32 %v912_v21, %v907_v34  ;;  %v918_v43 = vmul.f32 %v916_v29, %v907_v34  ;;  %v933_v45 = vmul.f32 %v928_v38, %v923_v41  ;;  %v934_v46 = vmul.f32 %v932_v39, %v923_v41 }
 0x348   : > { %v903_v10 = vadd.f32 %v901_v57, %v887_v56  ;;  %v904_v42 = vadd.f32 %v902_v1, %v888_v40 }
 0x34a   : > { %v919_v14 = vadd.f32 %v917_v63, %v903_v10  ;;  %v920_v44 = vadd.f32 %v918_v43, %v904_v42 }
 0x34c   : > { %v935_v47 = vadd.f32 %v933_v45, %v919_v14  ;;  %v936_v48 = vadd.f32 %v934_v46, %v920_v44 }
 0x34e   : > { %v942_v49 = vadd.f32 %v940_v18, %v935_v47  ;;  %v943_v50 = vadd.f32 %v940_v18, %v936_v48 }
 0x350   : > { %v949_v61 = vmul.f32 %v947_v16, %v942_v49  ;;  %v950_v51 = vmul.f32 %v947_v16, %v943_v50 }
 0x352   : > { %v953_v52 = vcombine.low %v949_v61, %v950_v51 }
 0x354   : > { %v955_v11 = vadd.f32 %v953_v52, %v1539_v31 }
 0x356   : > { %956 = vst [vmem:[%s137_s14] sm:$0xff] %v955_v11 }
 0x357   : > { %1158 = shalt.err (!%p1155_p3)
}
 0x358   : > { %s1159_s27 = scalar_lea.hbm %s970_s22, 128  ;;  %s1163_s30 = scalar_lea.hbm %s1616_s2, 256 }
 0x359   : > { %p1160_p4 = scmp.ne.s32.totalorder %s970_s22, %s1159_s27  ;;  %p1164_p9 = scmp.lt.s32.totalorder %s970_s22, %s1616_s2 }
 0x35a   : > { %p1165_p10 = scmp.lt.s32.totalorder %s1163_s30, %s1159_s27 }
 0x35b   : > { %p1161_p7 = pnand %p1160_p4, %p1282_p5 }
 0x35c   : > { %p1166_p11 = por %p1165_p10, %p1164_p9 }
 0x35d   : > { %p1162_p8 = pneg %p1161_p7 }
 0x35f   : > { %p1167_p12 = pnand %p1166_p11, %p1162_p8 }
 0x361   : > { %1170 = shalt.err (!%p1167_p12)
}
 0x362   : > { %1044 = dma.vmem_to_hbm [thread:$0]  (%p1282_p5), %s973_s16, 128, %s970_s22, %s958_s23  }
 0x363 PF: > { %p1050_p13 = scmp.ge.s32.totalorder %s1205_s12, 2  ;;  %s984_s5 = sand.u32 1, %s1193_s9  }
 0x364   : > { %s985_s6 = scalar_lea.sflag [#allocation3], %s984_s5 }
 0x365   : > { %p1047_p0 = pnand %p1050_p13, %p1286_p6 }
 0x367   : > { %p1048_p1 = pneg %p1047_p0 }
 0x369   : > { %1188 = dma.done.wait (%p1048_p1), %s985_s6, 128  }
 0x36a   : > { %1190 = vsyncadd (%p1048_p1), %s985_s6, 4294967168  ;;  %p12_p2 = scmp.ge.s32.totalorder %s1269_s15, 4   ;;  %s1619_s9 = smov %s1197_s10 }
 0x36b   : > { %s1620_s10 = smov %s1201_s11  ;;  %s1621_s11 = smov %s1280_s18 }
 0x36c   : > { %s1622_s12 = smov %s1269_s15  ;;  %14 = sbr.rel (!%p12_p2) target bundleno = 3 (0x3), region = 63 }
 0x371   :  { %990 = vsyncpa [#allocation3], 1 }
 0x372   :  { %992 = vsyncpa [#allocation3 + $0x1], 1 }

</bundles_post_ra>
